<compile_context>
chip_gen: v5e
topology: v5e:2x2
jax: 0.10.0
libtpu: 0.0.40
codegen_flags: <defaults>
</compile_context>

<pallas_src>
import jax
import jax.numpy as jnp
from jax import lax
from jax.experimental import pallas as pl
from jax.experimental.pallas import tpu as pltpu


def _round_up(x, m):
    return ((x + m - 1) // m) * m


def _chunk_len(t, cap=128):
    """Largest divisor of t that is <= cap (timesteps per grid step)."""
    for c in range(min(t, cap), 0, -1):
        if t % c == 0:
            return c
    return t


def _pick_tile(n, cap, align):
    """Largest divisor of n that is <= cap and a multiple of align."""
    best = n
    d = align
    while d <= min(n, cap):
        if n % d == 0:
            best = d
        d += align
    return best if n % best == 0 else n


# --------------------------------------------------------------------------
# Kernel 1: fused input-gate GEMM + serial GRU recurrence over one T-chunk.
#   x_ref    : [Tc*BP, D]  embedded inputs for this chunk (time-major rows)
#   h0_ref   : [BP, D]     initial hidden state (resident)
#   w_ih_ref : [D, 3D]     fused input->gate weights, gate order (r, z, n)
#   w_hh_ref : [D, 3D]     fused hidden->gate weights
#   b_i_ref  : [1, 3D]     b_ih with the r/z hidden biases folded in
#   b_hn_ref : [1, D]      hidden bias of the n gate (stays inside r*(.))
#   hs_ref   : [Tc*BP, D]  output hidden states for this chunk
#   h_scr    : [BP, D]     VMEM scratch carrying h across chunks
#   gi_scr   : [Tc*BP, 3D] VMEM scratch for the chunk's input-path gates
# --------------------------------------------------------------------------
def gru_chunk_kernel(x_ref, h0_ref, w_ih_ref, w_hh_ref, b_i_ref, b_hn_ref,
                     hs_ref, h_scr, gi_scr):
    BP, D = h0_ref.shape
    Tc = x_ref.shape[0] // BP

    @pl.when(pl.program_id(0) == 0)
    def _():
        h_scr[...] = h0_ref[...]

    # One fused input-gate GEMM for the whole chunk (off the serial path);
    # r/z hidden biases are already folded into b_i.
    gi_scr[...] = (
        jnp.dot(x_ref[...], w_ih_ref[...], preferred_element_type=jnp.float32)
        + b_i_ref[...]
    )

    # Hoist loop-invariant loads out of the serial loop.
    w_hh = w_hh_ref[...]                                   # [D, 3D]
    b_hn = b_hn_ref[...]                                   # [1, D]

    def step(t, h):
        off = pl.multiple_of(t * BP, BP)
        gi_t = gi_scr[pl.ds(off, BP), :]                   # [BP, 3D]
        # The only matmul on the serial critical path: [BP,D] x [D,3D].
        gh = jnp.dot(h, w_hh, preferred_element_type=jnp.float32)
        r = jax.nn.sigmoid(gi_t[:, 0:D] + gh[:, 0:D])
        z = jax.nn.sigmoid(gi_t[:, D:2 * D] + gh[:, D:2 * D])
        n = jnp.tanh(gi_t[:, 2 * D:] + r * (gh[:, 2 * D:] + b_hn))
        h_new = (1.0 - z) * n + z * h
        hs_ref[pl.ds(off, BP), :] = h_new
        return h_new

    h_final = lax.fori_loop(0, Tc, step, h_scr[...], unroll=(Tc <= 32))
    h_scr[...] = h_final                                   # carry to next chunk


# --------------------------------------------------------------------------
# Kernel 2: tiled matmul + bias for the FC projection (lane-dense output).
# --------------------------------------------------------------------------
def matmul_bias_kernel(x_ref, w_ref, b_ref, o_ref):
    o_ref[...] = (
        jnp.dot(x_ref[...], w_ref[...], preferred_element_type=jnp.float32)
        + b_ref[...]
    )


# --------------------------------------------------------------------------
# Parameters (synthetic, PyTorch-equivalent shapes, pre-fused/pre-transposed):
# GRU gate weights concatenated on the N axis, gate order (r, z, n), laid out
# for x @ W.
# --------------------------------------------------------------------------
def init_params(key, vocab_size, embed_dim=32):
    ks = jax.random.split(key, 7)
    D, V = embed_dim, vocab_size
    k = 1.0 / jnp.sqrt(jnp.float32(D))
    return {
        "emb": jax.random.normal(ks[0], (V, D), jnp.float32),
        "w_ih": jax.random.uniform(ks[1], (D, 3 * D), jnp.float32, -k, k),
        "w_hh": jax.random.uniform(ks[2], (D, 3 * D), jnp.float32, -k, k),
        "b_ih": jax.random.uniform(ks[3], (1, 3 * D), jnp.float32, -k, k),
        "b_hh": jax.random.uniform(ks[4], (1, 3 * D), jnp.float32, -k, k),
        "w_fc": jax.random.uniform(ks[5], (D, V), jnp.float32, -k, k),
        "b_fc": jax.random.uniform(ks[6], (1, V), jnp.float32, -k, k),
    }


# --------------------------------------------------------------------------
# Forward: tokens int32 [B, T], optional hidden [1, B, D]
# Returns (logits [B, T, V], hidden [1, B, D]) — same semantics as MiniLLM.
# --------------------------------------------------------------------------
def mini_llm_forward(tokens, params, hidden=None):
    B, T = tokens.shape
    V, D = params["emb"].shape
    G = 3 * D
    BP = _round_up(B, 8)       # pad batch to 8 sublanes
    VP = _round_up(V, 128)     # pad vocab to 128 lanes (lane-dense stores)

    # TODO(synk): embedding gather + pad layout plumbing kept in plain JAX
    # (a DMA-gather Pallas kernel adds nothing at these sizes).
    # Time-major gather: transpose the int32 token matrix, not f32 activations.
    emb_tm = jnp.take(params["emb"], tokens.T, axis=0).astype(jnp.float32)   # [T,B,D]
    emb_tm = jnp.pad(emb_tm, ((0, 0), (0, BP - B), (0, 0)))                  # [T,BP,D]
    x2d = emb_tm.reshape(T * BP, D)                                          # [T*BP,D]

    if hidden is None:
        h0 = jnp.zeros((BP, D), jnp.float32)
    else:
        h0 = jnp.pad(hidden[0].astype(jnp.float32), ((0, BP - B), (0, 0)))

    w_ih = params["w_ih"].astype(jnp.float32)
    w_hh = params["w_hh"].astype(jnp.float32)
    # Fold the r/z hidden biases into the input-path bias (added once in the
    # hoisted GI GEMM); only b_hh_n stays on the serial path.
    b_i = (params["b_ih"]
           + params["b_hh"].at[:, 2 * D:].set(0.0)).astype(jnp.float32)      # [1,3D]
    b_hn = params["b_hh"][:, 2 * D:].astype(jnp.float32)                     # [1,D]
    # Zero-pad the FC projection out to VP lanes; wrapper slices back to V.
    w_fc = jnp.pad(params["w_fc"].astype(jnp.float32), ((0, 0), (0, VP - V)))
    b_fc = jnp.pad(params["b_fc"].astype(jnp.float32), ((0, 0), (0, VP - V)))

    # ---- (1) fused input-GEMM + GRU recurrence, chunked over T -------------
    Tc = _chunk_len(T, cap=128)
    num_chunks = T // Tc

    hs = pl.pallas_call(
        gru_chunk_kernel,
        out_shape=jax.ShapeDtypeStruct((T * BP, D), jnp.float32),
        grid_spec=pltpu.PrefetchScalarGridSpec(
            num_scalar_prefetch=0,
            grid=(num_chunks,),
            in_specs=[
                pl.BlockSpec((Tc * BP, D), lambda c: (c, 0)),   # x chunk
                pl.BlockSpec((BP, D), lambda c: (0, 0)),        # h0 (resident)
                pl.BlockSpec((D, G), lambda c: (0, 0)),         # w_ih (resident)
                pl.BlockSpec((D, G), lambda c: (0, 0)),         # w_hh (resident)
                pl.BlockSpec((1, G), lambda c: (0, 0)),         # folded b_i
                pl.BlockSpec((1, D), lambda c: (0, 0)),         # b_hh_n
            ],
            out_specs=pl.BlockSpec((Tc * BP, D), lambda c: (c, 0)),
            scratch_shapes=[
                pltpu.VMEM((BP, D), jnp.float32),               # carried h
                pltpu.VMEM((Tc * BP, G), jnp.float32),          # chunk GI
            ],
        ),
        compiler_params=pltpu.CompilerParams(
            dimension_semantics=("arbitrary",)),
    )(x2d, h0, w_ih, w_hh, b_i, b_hn)

    # Final hidden state comes straight out of hs (no extra kernel output).
    hs_t = hs.reshape(T, BP, D)
    h_last = hs_t[-1, :B]                                        # [B, D]

    # Batch-major transpose of the SMALL tensor (D wide) before the FC GEMM,
    # so logits never need a post-hoc transpose over the vocab axis.
    hs_bm = jnp.transpose(hs_t, (1, 0, 2)).reshape(BP * T, D)    # [BP*T, D]

    # ---- (2) FC projection: tiled, lane-dense, "parallel" grid -------------
    rows = BP * T
    tm = _pick_tile(rows, cap=512, align=8)
    tn = _pick_tile(VP, cap=2048, align=128)

    logits2d = pl.pallas_call(
        matmul_bias_kernel,
        out_shape=jax.ShapeDtypeStruct((rows, VP), jnp.float32),
        grid=(rows // tm, VP // tn),
        in_specs=[
            pl.BlockSpec((tm, D), lambda i, j: (i, 0)),
            pl.BlockSpec((D, tn), lambda i, j: (0, j)),
            pl.BlockSpec((1, tn), lambda i, j: (0, j)),
        ],
        out_specs=pl.BlockSpec((tm, tn), lambda i, j: (i, j)),
        compiler_params=pltpu.CompilerParams(
            dimension_semantics=("parallel", "parallel")),
    )(hs_bm, w_fc, b_fc)

    logits = logits2d.reshape(BP, T, VP)[:B, :, :V]              # [B, T, V]
    return logits, h_last[None, :, :]                            # hidden [1,B,D]


# --------------------------------------------------------------------------
# Pure-JAX reference with identical GRU semantics (for validation).
# --------------------------------------------------------------------------
def reference_forward(tokens, params, hidden=None):
    B, T = tokens.shape
    D = params["emb"].shape[1]
    hp = "highest"
    emb = jnp.take(params["emb"], tokens, axis=0)                 # [B, T, D]
    h0 = (jnp.zeros((B, D), jnp.float32) if hidden is None
          else hidden[0].astype(jnp.float32))

    def step(h, x_t):
        gi = jnp.dot(x_t, params["w_ih"], precision=hp) + params["b_ih"]
        gh = jnp.dot(h, params["w_hh"], precision=hp) + params["b_hh"]
        r = jax.nn.sigmoid(gi[:, :D] + gh[:, :D])
        z = jax.nn.sigmoid(gi[:, D:2 * D] + gh[:, D:2 * D])
        n = jnp.tanh(gi[:, 2 * D:] + r * gh[:, 2 * D:])
        h_new = (1.0 - z) * n + z * h
        return h_new, h_new

    h_last, hs = lax.scan(step, h0, jnp.transpose(emb, (1, 0, 2)))
    logits = (jnp.einsum("tbd,dv->tbv", hs, params["w_fc"], precision=hp)
              + params["b_fc"][None])
    return jnp.transpose(logits, (1, 0, 2)), h_last[None]


if __name__ == "__main__":
    VOCAB, D, B, T = 64, 32, 2, 8
    key = jax.random.PRNGKey(0)
    pkey, tkey = jax.random.split(key)

    params = init_params(pkey, VOCAB, D)
    tokens = jax.random.randint(tkey, (B, T), 0, VOCAB, dtype=jnp.int32)

    fwd = jax.jit(mini_llm_forward)
    logits, hidden = fwd(tokens, params)
    logits = jax.block_until_ready(logits)
    hidden = jax.block_until_ready(hidden)

    ref_logits, ref_hidden = reference_forward(tokens, params)
    assert logits.shape == (B, T, VOCAB) and hidden.shape == (1, B, D)
    assert jnp.allclose(logits, ref_logits, atol=1e-3, rtol=1e-3)
    assert jnp.allclose(hidden, ref_hidden, atol=1e-3, rtol=1e-3)
    print("KERNEL_OK")
</pallas_src>

<mosaic_0001>
module attributes {stable_mosaic.version = 11 : i64} {
  func.func @gru_chunk_kernel(%arg0: i32, %arg1: memref<64x32xf32, #tpu.memory_space<vmem>>, %arg2: memref<8x32xf32, #tpu.memory_space<vmem>>, %arg3: memref<32x96xf32, #tpu.memory_space<vmem>>, %arg4: memref<32x96xf32, #tpu.memory_space<vmem>>, %arg5: memref<1x96xf32, #tpu.memory_space<vmem>>, %arg6: memref<1x32xf32, #tpu.memory_space<vmem>>, %arg7: memref<64x32xf32, #tpu.memory_space<vmem>>, %arg8: memref<8x32xf32, #tpu.memory_space<vmem>>, %arg9: memref<64x96xf32, #tpu.memory_space<vmem>>) attributes {dimension_semantics = [#tpu.dimension_semantics<arbitrary>], iteration_bounds = array<i64: 1>, scalar_prefetch = 0 : i64, scratch_operands = 2 : i64, tpu.core_type = #tpu.core_type<tc>, window_params = [{transform_indices = @transform_0, window_bounds = array<i64: 64, 32>}, {pipeline_mode = #tpu.pipeline_mode<synchronous>, transform_indices = @transform_1, window_bounds = array<i64: 8, 32>}, {pipeline_mode = #tpu.pipeline_mode<synchronous>, transform_indices = @transform_2, window_bounds = array<i64: 32, 96>}, {pipeline_mode = #tpu.pipeline_mode<synchronous>, transform_indices = @transform_3, window_bounds = array<i64: 32, 96>}, {pipeline_mode = #tpu.pipeline_mode<synchronous>, transform_indices = @transform_4, window_bounds = array<i64: 1, 96>}, {pipeline_mode = #tpu.pipeline_mode<synchronous>, transform_indices = @transform_5, window_bounds = array<i64: 1, 32>}, {transform_indices = @transform_6, window_bounds = array<i64: 64, 32>}]} {
    %c0_i32 = arith.constant 0 : i32
    %0 = arith.cmpi eq, %arg0, %c0_i32 : i32
    %1 = arith.extui %0 : i1 to i32
    %c0_i32_0 = arith.constant 0 : i32
    %2 = arith.cmpi ne, %1, %c0_i32_0 : i32
    scf.if %2 {
      %c0_73 = arith.constant 0 : index
      %c0_74 = arith.constant 0 : index
      %294 = vector.load %arg2[%c0_73, %c0_74] : memref<8x32xf32, #tpu.memory_space<vmem>>, vector<8x32xf32>
      %c0_75 = arith.constant 0 : index
      %c0_76 = arith.constant 0 : index
      %295 = vector.load %arg8[%c0_75, %c0_76] : memref<8x32xf32, #tpu.memory_space<vmem>>, vector<8x32xf32>
      tpu.vector_store %arg8[%c0_75, %c0_76], %294 {strides = array<i32>} : memref<8x32xf32, #tpu.memory_space<vmem>>, vector<8x32xf32>,
    } else {
    }
    %c0 = arith.constant 0 : index
    %c0_1 = arith.constant 0 : index
    %3 = vector.load %arg1[%c0, %c0_1] : memref<64x32xf32, #tpu.memory_space<vmem>>, vector<64x32xf32>
    %c0_2 = arith.constant 0 : index
    %c0_3 = arith.constant 0 : index
    %4 = vector.load %arg3[%c0_2, %c0_3] : memref<32x96xf32, #tpu.memory_space<vmem>>, vector<32x96xf32>
    %cst = arith.constant dense<0.000000e+00> : vector<64x96xf32>
    %5 = tpu.matmul %3, %4, %cst {dimension_numbers = #tpu.dot_dimension_numbers<[1], [0], [0], [1], [0, 0, 1, 1], [], []>} : vector<64x32xf32>, vector<32x96xf32>, vector<64x96xf32> -> vector<64x96xf32>
    %c0_4 = arith.constant 0 : index
    %c0_5 = arith.constant 0 : index
    %6 = vector.load %arg5[%c0_4, %c0_5] : memref<1x96xf32, #tpu.memory_space<vmem>>, vector<1x96xf32>
    %7 = vector.broadcast %6 : vector<1x96xf32> to vector<64x96xf32>
    %8 = arith.addf %5, %7 : vector<64x96xf32>
    %c0_6 = arith.constant 0 : index
    %c0_7 = arith.constant 0 : index
    %9 = vector.load %arg9[%c0_6, %c0_7] : memref<64x96xf32, #tpu.memory_space<vmem>>, vector<64x96xf32>
    tpu.vector_store %arg9[%c0_6, %c0_7], %8 {strides = array<i32>} : memref<64x96xf32, #tpu.memory_space<vmem>>, vector<64x96xf32>,
    %c0_8 = arith.constant 0 : index
    %c0_9 = arith.constant 0 : index
    %10 = vector.load %arg4[%c0_8, %c0_9] : memref<32x96xf32, #tpu.memory_space<vmem>>, vector<32x96xf32>
    %c0_10 = arith.constant 0 : index
    %c0_11 = arith.constant 0 : index
    %11 = vector.load %arg6[%c0_10, %c0_11] : memref<1x32xf32, #tpu.memory_space<vmem>>, vector<1x32xf32>
    %c0_12 = arith.constant 0 : index
    %c0_13 = arith.constant 0 : index
    %12 = vector.load %arg8[%c0_12, %c0_13] : memref<8x32xf32, #tpu.memory_space<vmem>>, vector<8x32xf32>
    %c0_i32_14 = arith.constant 0 : i32
    %c8_i32 = arith.constant 8 : i32
    %13 = arith.muli %c0_i32_14, %c8_i32 : i32
    %14 = tpu.assume_multiple %13, 8 : i32
    %15 = arith.index_cast %14 : i32 to index
    %c0_15 = arith.constant 0 : index
    %16 = vector.load %arg9[%15, %c0_15] : memref<64x96xf32, #tpu.memory_space<vmem>>, vector<8x96xf32>
    %cst_16 = arith.constant dense<0.000000e+00> : vector<8x96xf32>
    %17 = tpu.matmul %12, %10, %cst_16 {dimension_numbers = #tpu.dot_dimension_numbers<[1], [0], [0], [1], [0, 0, 1, 1], [], []>} : vector<8x32xf32>, vector<32x96xf32>, vector<8x96xf32> -> vector<8x96xf32>
    %18 = vector.extract_strided_slice %16 {offsets = [0, 0], sizes = [8, 32], strides = [1, 1]} : vector<8x96xf32> to vector<8x32xf32>
    %19 = vector.extract_strided_slice %17 {offsets = [0, 0], sizes = [8, 32], strides = [1, 1]} : vector<8x96xf32> to vector<8x32xf32>
    %20 = arith.addf %18, %19 : vector<8x32xf32>
    %21 = arith.negf %20 : vector<8x32xf32>
    %22 = math.exp %21 : vector<8x32xf32>
    %cst_17 = arith.constant 1.000000e+00 : f32
    %23 = vector.broadcast %cst_17 : f32 to vector<8x32xf32>
    %24 = arith.addf %23, %22 : vector<8x32xf32>
    %25 = arith.divf %23, %24 : vector<8x32xf32>
    %26 = vector.extract_strided_slice %16 {offsets = [0, 32], sizes = [8, 32], strides = [1, 1]} : vector<8x96xf32> to vector<8x32xf32>
    %27 = vector.extract_strided_slice %17 {offsets = [0, 32], sizes = [8, 32], strides = [1, 1]} : vector<8x96xf32> to vector<8x32xf32>
    %28 = arith.addf %26, %27 : vector<8x32xf32>
    %29 = arith.negf %28 : vector<8x32xf32>
    %30 = math.exp %29 : vector<8x32xf32>
    %cst_18 = arith.constant 1.000000e+00 : f32
    %31 = vector.broadcast %cst_18 : f32 to vector<8x32xf32>
    %32 = arith.addf %31, %30 : vector<8x32xf32>
    %33 = arith.divf %31, %32 : vector<8x32xf32>
    %34 = vector.extract_strided_slice %16 {offsets = [0, 64], sizes = [8, 32], strides = [1, 1]} : vector<8x96xf32> to vector<8x32xf32>
    %35 = vector.extract_strided_slice %17 {offsets = [0, 64], sizes = [8, 32], strides = [1, 1]} : vector<8x96xf32> to vector<8x32xf32>
    %36 = vector.broadcast %11 : vector<1x32xf32> to vector<8x32xf32>
    %37 = arith.addf %35, %36 : vector<8x32xf32>
    %38 = arith.mulf %25, %37 : vector<8x32xf32>
    %39 = arith.addf %34, %38 : vector<8x32xf32>
    %40 = math.tanh %39 : vector<8x32xf32>
    %cst_19 = arith.constant 1.000000e+00 : f32
    %41 = vector.broadcast %cst_19 : f32 to vector<8x32xf32>
    %42 = arith.subf %41, %33 : vector<8x32xf32>
    %43 = arith.mulf %42, %40 : vector<8x32xf32>
    %44 = arith.mulf %33, %12 : vector<8x32xf32>
    %45 = arith.addf %43, %44 : vector<8x32xf32>
    %46 = arith.index_cast %14 : i32 to index
    %c0_20 = arith.constant 0 : index
    %47 = vector.load %arg7[%46, %c0_20] : memref<64x32xf32, #tpu.memory_space<vmem>>, vector<8x32xf32>
    tpu.vector_store %arg7[%46, %c0_20], %45 {strides = array<i32>} : memref<64x32xf32, #tpu.memory_space<vmem>>, vector<8x32xf32>,
    %c1_i32 = arith.constant 1 : i32
    %c8_i32_21 = arith.constant 8 : i32
    %48 = arith.muli %c1_i32, %c8_i32_21 : i32
    %49 = tpu.assume_multiple %48, 8 : i32
    %50 = arith.index_cast %49 : i32 to index
    %c0_22 = arith.constant 0 : index
    %51 = vector.load %arg9[%50, %c0_22] : memref<64x96xf32, #tpu.memory_space<vmem>>, vector<8x96xf32>
    %cst_23 = arith.constant dense<0.000000e+00> : vector<8x96xf32>
    %52 = tpu.matmul %45, %10, %cst_23 {dimension_numbers = #tpu.dot_dimension_numbers<[1], [0], [0], [1], [0, 0, 1, 1], [], []>} : vector<8x32xf32>, vector<32x96xf32>, vector<8x96xf32> -> vector<8x96xf32>
    %53 = vector.extract_strided_slice %51 {offsets = [0, 0], sizes = [8, 32], strides = [1, 1]} : vector<8x96xf32> to vector<8x32xf32>
    %54 = vector.extract_strided_slice %52 {offsets = [0, 0], sizes = [8, 32], strides = [1, 1]} : vector<8x96xf32> to vector<8x32xf32>
    %55 = arith.addf %53, %54 : vector<8x32xf32>
    %56 = arith.negf %55 : vector<8x32xf32>
    %57 = math.exp %56 : vector<8x32xf32>
    %cst_24 = arith.constant 1.000000e+00 : f32
    %58 = vector.broadcast %cst_24 : f32 to vector<8x32xf32>
    %59 = arith.addf %58, %57 : vector<8x32xf32>
    %60 = arith.divf %58, %59 : vector<8x32xf32>
    %61 = vector.extract_strided_slice %51 {offsets = [0, 32], sizes = [8, 32], strides = [1, 1]} : vector<8x96xf32> to vector<8x32xf32>
    %62 = vector.extract_strided_slice %52 {offsets = [0, 32], sizes = [8, 32], strides = [1, 1]} : vector<8x96xf32> to vector<8x32xf32>
    %63 = arith.addf %61, %62 : vector<8x32xf32>
    %64 = arith.negf %63 : vector<8x32xf32>
    %65 = math.exp %64 : vector<8x32xf32>
    %cst_25 = arith.constant 1.000000e+00 : f32
    %66 = vector.broadcast %cst_25 : f32 to vector<8x32xf32>
    %67 = arith.addf %66, %65 : vector<8x32xf32>
    %68 = arith.divf %66, %67 : vector<8x32xf32>
    %69 = vector.extract_strided_slice %51 {offsets = [0, 64], sizes = [8, 32], strides = [1, 1]} : vector<8x96xf32> to vector<8x32xf32>
    %70 = vector.extract_strided_slice %52 {offsets = [0, 64], sizes = [8, 32], strides = [1, 1]} : vector<8x96xf32> to vector<8x32xf32>
    %71 = vector.broadcast %11 : vector<1x32xf32> to vector<8x32xf32>
    %72 = arith.addf %70, %71 : vector<8x32xf32>
    %73 = arith.mulf %60, %72 : vector<8x32xf32>
    %74 = arith.addf %69, %73 : vector<8x32xf32>
    %75 = math.tanh %74 : vector<8x32xf32>
    %cst_26 = arith.constant 1.000000e+00 : f32
    %76 = vector.broadcast %cst_26 : f32 to vector<8x32xf32>
    %77 = arith.subf %76, %68 : vector<8x32xf32>
    %78 = arith.mulf %77, %75 : vector<8x32xf32>
    %79 = arith.mulf %68, %45 : vector<8x32xf32>
    %80 = arith.addf %78, %79 : vector<8x32xf32>
    %81 = arith.index_cast %49 : i32 to index
    %c0_27 = arith.constant 0 : index
    %82 = vector.load %arg7[%81, %c0_27] : memref<64x32xf32, #tpu.memory_space<vmem>>, vector<8x32xf32>
    tpu.vector_store %arg7[%81, %c0_27], %80 {strides = array<i32>} : memref<64x32xf32, #tpu.memory_space<vmem>>, vector<8x32xf32>,
    %c2_i32 = arith.constant 2 : i32
    %c8_i32_28 = arith.constant 8 : i32
    %83 = arith.muli %c2_i32, %c8_i32_28 : i32
    %84 = tpu.assume_multiple %83, 8 : i32
    %85 = arith.index_cast %84 : i32 to index
    %c0_29 = arith.constant 0 : index
    %86 = vector.load %arg9[%85, %c0_29] : memref<64x96xf32, #tpu.memory_space<vmem>>, vector<8x96xf32>
    %cst_30 = arith.constant dense<0.000000e+00> : vector<8x96xf32>
    %87 = tpu.matmul %80, %10, %cst_30 {dimension_numbers = #tpu.dot_dimension_numbers<[1], [0], [0], [1], [0, 0, 1, 1], [], []>} : vector<8x32xf32>, vector<32x96xf32>, vector<8x96xf32> -> vector<8x96xf32>
    %88 = vector.extract_strided_slice %86 {offsets = [0, 0], sizes = [8, 32], strides = [1, 1]} : vector<8x96xf32> to vector<8x32xf32>
    %89 = vector.extract_strided_slice %87 {offsets = [0, 0], sizes = [8, 32], strides = [1, 1]} : vector<8x96xf32> to vector<8x32xf32>
    %90 = arith.addf %88, %89 : vector<8x32xf32>
    %91 = arith.negf %90 : vector<8x32xf32>
    %92 = math.exp %91 : vector<8x32xf32>
    %cst_31 = arith.constant 1.000000e+00 : f32
    %93 = vector.broadcast %cst_31 : f32 to vector<8x32xf32>
    %94 = arith.addf %93, %92 : vector<8x32xf32>
    %95 = arith.divf %93, %94 : vector<8x32xf32>
    %96 = vector.extract_strided_slice %86 {offsets = [0, 32], sizes = [8, 32], strides = [1, 1]} : vector<8x96xf32> to vector<8x32xf32>
    %97 = vector.extract_strided_slice %87 {offsets = [0, 32], sizes = [8, 32], strides = [1, 1]} : vector<8x96xf32> to vector<8x32xf32>
    %98 = arith.addf %96, %97 : vector<8x32xf32>
    %99 = arith.negf %98 : vector<8x32xf32>
    %100 = math.exp %99 : vector<8x32xf32>
    %cst_32 = arith.constant 1.000000e+00 : f32
    %101 = vector.broadcast %cst_32 : f32 to vector<8x32xf32>
    %102 = arith.addf %101, %100 : vector<8x32xf32>
    %103 = arith.divf %101, %102 : vector<8x32xf32>
    %104 = vector.extract_strided_slice %86 {offsets = [0, 64], sizes = [8, 32], strides = [1, 1]} : vector<8x96xf32> to vector<8x32xf32>
    %105 = vector.extract_strided_slice %87 {offsets = [0, 64], sizes = [8, 32], strides = [1, 1]} : vector<8x96xf32> to vector<8x32xf32>
    %106 = vector.broadcast %11 : vector<1x32xf32> to vector<8x32xf32>
    %107 = arith.addf %105, %106 : vector<8x32xf32>
    %108 = arith.mulf %95, %107 : vector<8x32xf32>
    %109 = arith.addf %104, %108 : vector<8x32xf32>
    %110 = math.tanh %109 : vector<8x32xf32>
    %cst_33 = arith.constant 1.000000e+00 : f32
    %111 = vector.broadcast %cst_33 : f32 to vector<8x32xf32>
    %112 = arith.subf %111, %103 : vector<8x32xf32>
    %113 = arith.mulf %112, %110 : vector<8x32xf32>
    %114 = arith.mulf %103, %80 : vector<8x32xf32>
    %115 = arith.addf %113, %114 : vector<8x32xf32>
    %116 = arith.index_cast %84 : i32 to index
    %c0_34 = arith.constant 0 : index
    %117 = vector.load %arg7[%116, %c0_34] : memref<64x32xf32, #tpu.memory_space<vmem>>, vector<8x32xf32>
    tpu.vector_store %arg7[%116, %c0_34], %115 {strides = array<i32>} : memref<64x32xf32, #tpu.memory_space<vmem>>, vector<8x32xf32>,
    %c3_i32 = arith.constant 3 : i32
    %c8_i32_35 = arith.constant 8 : i32
    %118 = arith.muli %c3_i32, %c8_i32_35 : i32
    %119 = tpu.assume_multiple %118, 8 : i32
    %120 = arith.index_cast %119 : i32 to index
    %c0_36 = arith.constant 0 : index
    %121 = vector.load %arg9[%120, %c0_36] : memref<64x96xf32, #tpu.memory_space<vmem>>, vector<8x96xf32>
    %cst_37 = arith.constant dense<0.000000e+00> : vector<8x96xf32>
    %122 = tpu.matmul %115, %10, %cst_37 {dimension_numbers = #tpu.dot_dimension_numbers<[1], [0], [0], [1], [0, 0, 1, 1], [], []>} : vector<8x32xf32>, vector<32x96xf32>, vector<8x96xf32> -> vector<8x96xf32>
    %123 = vector.extract_strided_slice %121 {offsets = [0, 0], sizes = [8, 32], strides = [1, 1]} : vector<8x96xf32> to vector<8x32xf32>
    %124 = vector.extract_strided_slice %122 {offsets = [0, 0], sizes = [8, 32], strides = [1, 1]} : vector<8x96xf32> to vector<8x32xf32>
    %125 = arith.addf %123, %124 : vector<8x32xf32>
    %126 = arith.negf %125 : vector<8x32xf32>
    %127 = math.exp %126 : vector<8x32xf32>
    %cst_38 = arith.constant 1.000000e+00 : f32
    %128 = vector.broadcast %cst_38 : f32 to vector<8x32xf32>
    %129 = arith.addf %128, %127 : vector<8x32xf32>
    %130 = arith.divf %128, %129 : vector<8x32xf32>
    %131 = vector.extract_strided_slice %121 {offsets = [0, 32], sizes = [8, 32], strides = [1, 1]} : vector<8x96xf32> to vector<8x32xf32>
    %132 = vector.extract_strided_slice %122 {offsets = [0, 32], sizes = [8, 32], strides = [1, 1]} : vector<8x96xf32> to vector<8x32xf32>
    %133 = arith.addf %131, %132 : vector<8x32xf32>
    %134 = arith.negf %133 : vector<8x32xf32>
    %135 = math.exp %134 : vector<8x32xf32>
    %cst_39 = arith.constant 1.000000e+00 : f32
    %136 = vector.broadcast %cst_39 : f32 to vector<8x32xf32>
    %137 = arith.addf %136, %135 : vector<8x32xf32>
    %138 = arith.divf %136, %137 : vector<8x32xf32>
    %139 = vector.extract_strided_slice %121 {offsets = [0, 64], sizes = [8, 32], strides = [1, 1]} : vector<8x96xf32> to vector<8x32xf32>
    %140 = vector.extract_strided_slice %122 {offsets = [0, 64], sizes = [8, 32], strides = [1, 1]} : vector<8x96xf32> to vector<8x32xf32>
    %141 = vector.broadcast %11 : vector<1x32xf32> to vector<8x32xf32>
    %142 = arith.addf %140, %141 : vector<8x32xf32>
    %143 = arith.mulf %130, %142 : vector<8x32xf32>
    %144 = arith.addf %139, %143 : vector<8x32xf32>
    %145 = math.tanh %144 : vector<8x32xf32>
    %cst_40 = arith.constant 1.000000e+00 : f32
    %146 = vector.broadcast %cst_40 : f32 to vector<8x32xf32>
    %147 = arith.subf %146, %138 : vector<8x32xf32>
    %148 = arith.mulf %147, %145 : vector<8x32xf32>
    %149 = arith.mulf %138, %115 : vector<8x32xf32>
    %150 = arith.addf %148, %149 : vector<8x32xf32>
    %151 = arith.index_cast %119 : i32 to index
    %c0_41 = arith.constant 0 : index
    %152 = vector.load %arg7[%151, %c0_41] : memref<64x32xf32, #tpu.memory_space<vmem>>, vector<8x32xf32>
    tpu.vector_store %arg7[%151, %c0_41], %150 {strides = array<i32>} : memref<64x32xf32, #tpu.memory_space<vmem>>, vector<8x32xf32>,
    %c4_i32 = arith.constant 4 : i32
    %c8_i32_42 = arith.constant 8 : i32
    %153 = arith.muli %c4_i32, %c8_i32_42 : i32
    %154 = tpu.assume_multiple %153, 8 : i32
    %155 = arith.index_cast %154 : i32 to index
    %c0_43 = arith.constant 0 : index
    %156 = vector.load %arg9[%155, %c0_43] : memref<64x96xf32, #tpu.memory_space<vmem>>, vector<8x96xf32>
    %cst_44 = arith.constant dense<0.000000e+00> : vector<8x96xf32>
    %157 = tpu.matmul %150, %10, %cst_44 {dimension_numbers = #tpu.dot_dimension_numbers<[1], [0], [0], [1], [0, 0, 1, 1], [], []>} : vector<8x32xf32>, vector<32x96xf32>, vector<8x96xf32> -> vector<8x96xf32>
    %158 = vector.extract_strided_slice %156 {offsets = [0, 0], sizes = [8, 32], strides = [1, 1]} : vector<8x96xf32> to vector<8x32xf32>
    %159 = vector.extract_strided_slice %157 {offsets = [0, 0], sizes = [8, 32], strides = [1, 1]} : vector<8x96xf32> to vector<8x32xf32>
    %160 = arith.addf %158, %159 : vector<8x32xf32>
    %161 = arith.negf %160 : vector<8x32xf32>
    %162 = math.exp %161 : vector<8x32xf32>
    %cst_45 = arith.constant 1.000000e+00 : f32
    %163 = vector.broadcast %cst_45 : f32 to vector<8x32xf32>
    %164 = arith.addf %163, %162 : vector<8x32xf32>
    %165 = arith.divf %163, %164 : vector<8x32xf32>
    %166 = vector.extract_strided_slice %156 {offsets = [0, 32], sizes = [8, 32], strides = [1, 1]} : vector<8x96xf32> to vector<8x32xf32>
    %167 = vector.extract_strided_slice %157 {offsets = [0, 32], sizes = [8, 32], strides = [1, 1]} : vector<8x96xf32> to vector<8x32xf32>
    %168 = arith.addf %166, %167 : vector<8x32xf32>
    %169 = arith.negf %168 : vector<8x32xf32>
    %170 = math.exp %169 : vector<8x32xf32>
    %cst_46 = arith.constant 1.000000e+00 : f32
    %171 = vector.broadcast %cst_46 : f32 to vector<8x32xf32>
    %172 = arith.addf %171, %170 : vector<8x32xf32>
    %173 = arith.divf %171, %172 : vector<8x32xf32>
    %174 = vector.extract_strided_slice %156 {offsets = [0, 64], sizes = [8, 32], strides = [1, 1]} : vector<8x96xf32> to vector<8x32xf32>
    %175 = vector.extract_strided_slice %157 {offsets = [0, 64], sizes = [8, 32], strides = [1, 1]} : vector<8x96xf32> to vector<8x32xf32>
    %176 = vector.broadcast %11 : vector<1x32xf32> to vector<8x32xf32>
    %177 = arith.addf %175, %176 : vector<8x32xf32>
    %178 = arith.mulf %165, %177 : vector<8x32xf32>
    %179 = arith.addf %174, %178 : vector<8x32xf32>
    %180 = math.tanh %179 : vector<8x32xf32>
    %cst_47 = arith.constant 1.000000e+00 : f32
    %181 = vector.broadcast %cst_47 : f32 to vector<8x32xf32>
    %182 = arith.subf %181, %173 : vector<8x32xf32>
    %183 = arith.mulf %182, %180 : vector<8x32xf32>
    %184 = arith.mulf %173, %150 : vector<8x32xf32>
    %185 = arith.addf %183, %184 : vector<8x32xf32>
    %186 = arith.index_cast %154 : i32 to index
    %c0_48 = arith.constant 0 : index
    %187 = vector.load %arg7[%186, %c0_48] : memref<64x32xf32, #tpu.memory_space<vmem>>, vector<8x32xf32>
    tpu.vector_store %arg7[%186, %c0_48], %185 {strides = array<i32>} : memref<64x32xf32, #tpu.memory_space<vmem>>, vector<8x32xf32>,
    %c5_i32 = arith.constant 5 : i32
    %c8_i32_49 = arith.constant 8 : i32
    %188 = arith.muli %c5_i32, %c8_i32_49 : i32
    %189 = tpu.assume_multiple %188, 8 : i32
    %190 = arith.index_cast %189 : i32 to index
    %c0_50 = arith.constant 0 : index
    %191 = vector.load %arg9[%190, %c0_50] : memref<64x96xf32, #tpu.memory_space<vmem>>, vector<8x96xf32>
    %cst_51 = arith.constant dense<0.000000e+00> : vector<8x96xf32>
    %192 = tpu.matmul %185, %10, %cst_51 {dimension_numbers = #tpu.dot_dimension_numbers<[1], [0], [0], [1], [0, 0, 1, 1], [], []>} : vector<8x32xf32>, vector<32x96xf32>, vector<8x96xf32> -> vector<8x96xf32>
    %193 = vector.extract_strided_slice %191 {offsets = [0, 0], sizes = [8, 32], strides = [1, 1]} : vector<8x96xf32> to vector<8x32xf32>
    %194 = vector.extract_strided_slice %192 {offsets = [0, 0], sizes = [8, 32], strides = [1, 1]} : vector<8x96xf32> to vector<8x32xf32>
    %195 = arith.addf %193, %194 : vector<8x32xf32>
    %196 = arith.negf %195 : vector<8x32xf32>
    %197 = math.exp %196 : vector<8x32xf32>
    %cst_52 = arith.constant 1.000000e+00 : f32
    %198 = vector.broadcast %cst_52 : f32 to vector<8x32xf32>
    %199 = arith.addf %198, %197 : vector<8x32xf32>
    %200 = arith.divf %198, %199 : vector<8x32xf32>
    %201 = vector.extract_strided_slice %191 {offsets = [0, 32], sizes = [8, 32], strides = [1, 1]} : vector<8x96xf32> to vector<8x32xf32>
    %202 = vector.extract_strided_slice %192 {offsets = [0, 32], sizes = [8, 32], strides = [1, 1]} : vector<8x96xf32> to vector<8x32xf32>
    %203 = arith.addf %201, %202 : vector<8x32xf32>
    %204 = arith.negf %203 : vector<8x32xf32>
    %205 = math.exp %204 : vector<8x32xf32>
    %cst_53 = arith.constant 1.000000e+00 : f32
    %206 = vector.broadcast %cst_53 : f32 to vector<8x32xf32>
    %207 = arith.addf %206, %205 : vector<8x32xf32>
    %208 = arith.divf %206, %207 : vector<8x32xf32>
    %209 = vector.extract_strided_slice %191 {offsets = [0, 64], sizes = [8, 32], strides = [1, 1]} : vector<8x96xf32> to vector<8x32xf32>
    %210 = vector.extract_strided_slice %192 {offsets = [0, 64], sizes = [8, 32], strides = [1, 1]} : vector<8x96xf32> to vector<8x32xf32>
    %211 = vector.broadcast %11 : vector<1x32xf32> to vector<8x32xf32>
    %212 = arith.addf %210, %211 : vector<8x32xf32>
    %213 = arith.mulf %200, %212 : vector<8x32xf32>
    %214 = arith.addf %209, %213 : vector<8x32xf32>
    %215 = math.tanh %214 : vector<8x32xf32>
    %cst_54 = arith.constant 1.000000e+00 : f32
    %216 = vector.broadcast %cst_54 : f32 to vector<8x32xf32>
    %217 = arith.subf %216, %208 : vector<8x32xf32>
    %218 = arith.mulf %217, %215 : vector<8x32xf32>
    %219 = arith.mulf %208, %185 : vector<8x32xf32>
    %220 = arith.addf %218, %219 : vector<8x32xf32>
    %221 = arith.index_cast %189 : i32 to index
    %c0_55 = arith.constant 0 : index
    %222 = vector.load %arg7[%221, %c0_55] : memref<64x32xf32, #tpu.memory_space<vmem>>, vector<8x32xf32>
    tpu.vector_store %arg7[%221, %c0_55], %220 {strides = array<i32>} : memref<64x32xf32, #tpu.memory_space<vmem>>, vector<8x32xf32>,
    %c6_i32 = arith.constant 6 : i32
    %c8_i32_56 = arith.constant 8 : i32
    %223 = arith.muli %c6_i32, %c8_i32_56 : i32
    %224 = tpu.assume_multiple %223, 8 : i32
    %225 = arith.index_cast %224 : i32 to index
    %c0_57 = arith.constant 0 : index
    %226 = vector.load %arg9[%225, %c0_57] : memref<64x96xf32, #tpu.memory_space<vmem>>, vector<8x96xf32>
    %cst_58 = arith.constant dense<0.000000e+00> : vector<8x96xf32>
    %227 = tpu.matmul %220, %10, %cst_58 {dimension_numbers = #tpu.dot_dimension_numbers<[1], [0], [0], [1], [0, 0, 1, 1], [], []>} : vector<8x32xf32>, vector<32x96xf32>, vector<8x96xf32> -> vector<8x96xf32>
    %228 = vector.extract_strided_slice %226 {offsets = [0, 0], sizes = [8, 32], strides = [1, 1]} : vector<8x96xf32> to vector<8x32xf32>
    %229 = vector.extract_strided_slice %227 {offsets = [0, 0], sizes = [8, 32], strides = [1, 1]} : vector<8x96xf32> to vector<8x32xf32>
    %230 = arith.addf %228, %229 : vector<8x32xf32>
    %231 = arith.negf %230 : vector<8x32xf32>
    %232 = math.exp %231 : vector<8x32xf32>
    %cst_59 = arith.constant 1.000000e+00 : f32
    %233 = vector.broadcast %cst_59 : f32 to vector<8x32xf32>
    %234 = arith.addf %233, %232 : vector<8x32xf32>
    %235 = arith.divf %233, %234 : vector<8x32xf32>
    %236 = vector.extract_strided_slice %226 {offsets = [0, 32], sizes = [8, 32], strides = [1, 1]} : vector<8x96xf32> to vector<8x32xf32>
    %237 = vector.extract_strided_slice %227 {offsets = [0, 32], sizes = [8, 32], strides = [1, 1]} : vector<8x96xf32> to vector<8x32xf32>
    %238 = arith.addf %236, %237 : vector<8x32xf32>
    %239 = arith.negf %238 : vector<8x32xf32>
    %240 = math.exp %239 : vector<8x32xf32>
    %cst_60 = arith.constant 1.000000e+00 : f32
    %241 = vector.broadcast %cst_60 : f32 to vector<8x32xf32>
    %242 = arith.addf %241, %240 : vector<8x32xf32>
    %243 = arith.divf %241, %242 : vector<8x32xf32>
    %244 = vector.extract_strided_slice %226 {offsets = [0, 64], sizes = [8, 32], strides = [1, 1]} : vector<8x96xf32> to vector<8x32xf32>
    %245 = vector.extract_strided_slice %227 {offsets = [0, 64], sizes = [8, 32], strides = [1, 1]} : vector<8x96xf32> to vector<8x32xf32>
    %246 = vector.broadcast %11 : vector<1x32xf32> to vector<8x32xf32>
    %247 = arith.addf %245, %246 : vector<8x32xf32>
    %248 = arith.mulf %235, %247 : vector<8x32xf32>
    %249 = arith.addf %244, %248 : vector<8x32xf32>
    %250 = math.tanh %249 : vector<8x32xf32>
    %cst_61 = arith.constant 1.000000e+00 : f32
    %251 = vector.broadcast %cst_61 : f32 to vector<8x32xf32>
    %252 = arith.subf %251, %243 : vector<8x32xf32>
    %253 = arith.mulf %252, %250 : vector<8x32xf32>
    %254 = arith.mulf %243, %220 : vector<8x32xf32>
    %255 = arith.addf %253, %254 : vector<8x32xf32>
    %256 = arith.index_cast %224 : i32 to index
    %c0_62 = arith.constant 0 : index
    %257 = vector.load %arg7[%256, %c0_62] : memref<64x32xf32, #tpu.memory_space<vmem>>, vector<8x32xf32>
    tpu.vector_store %arg7[%256, %c0_62], %255 {strides = array<i32>} : memref<64x32xf32, #tpu.memory_space<vmem>>, vector<8x32xf32>,
    %c7_i32 = arith.constant 7 : i32
    %c8_i32_63 = arith.constant 8 : i32
    %258 = arith.muli %c7_i32, %c8_i32_63 : i32
    %259 = tpu.assume_multiple %258, 8 : i32
    %260 = arith.index_cast %259 : i32 to index
    %c0_64 = arith.constant 0 : index
    %261 = vector.load %arg9[%260, %c0_64] : memref<64x96xf32, #tpu.memory_space<vmem>>, vector<8x96xf32>
    %cst_65 = arith.constant dense<0.000000e+00> : vector<8x96xf32>
    %262 = tpu.matmul %255, %10, %cst_65 {dimension_numbers = #tpu.dot_dimension_numbers<[1], [0], [0], [1], [0, 0, 1, 1], [], []>} : vector<8x32xf32>, vector<32x96xf32>, vector<8x96xf32> -> vector<8x96xf32>
    %263 = vector.extract_strided_slice %261 {offsets = [0, 0], sizes = [8, 32], strides = [1, 1]} : vector<8x96xf32> to vector<8x32xf32>
    %264 = vector.extract_strided_slice %262 {offsets = [0, 0], sizes = [8, 32], strides = [1, 1]} : vector<8x96xf32> to vector<8x32xf32>
    %265 = arith.addf %263, %264 : vector<8x32xf32>
    %266 = arith.negf %265 : vector<8x32xf32>
    %267 = math.exp %266 : vector<8x32xf32>
    %cst_66 = arith.constant 1.000000e+00 : f32
    %268 = vector.broadcast %cst_66 : f32 to vector<8x32xf32>
    %269 = arith.addf %268, %267 : vector<8x32xf32>
    %270 = arith.divf %268, %269 : vector<8x32xf32>
    %271 = vector.extract_strided_slice %261 {offsets = [0, 32], sizes = [8, 32], strides = [1, 1]} : vector<8x96xf32> to vector<8x32xf32>
    %272 = vector.extract_strided_slice %262 {offsets = [0, 32], sizes = [8, 32], strides = [1, 1]} : vector<8x96xf32> to vector<8x32xf32>
    %273 = arith.addf %271, %272 : vector<8x32xf32>
    %274 = arith.negf %273 : vector<8x32xf32>
    %275 = math.exp %274 : vector<8x32xf32>
    %cst_67 = arith.constant 1.000000e+00 : f32
    %276 = vector.broadcast %cst_67 : f32 to vector<8x32xf32>
    %277 = arith.addf %276, %275 : vector<8x32xf32>
    %278 = arith.divf %276, %277 : vector<8x32xf32>
    %279 = vector.extract_strided_slice %261 {offsets = [0, 64], sizes = [8, 32], strides = [1, 1]} : vector<8x96xf32> to vector<8x32xf32>
    %280 = vector.extract_strided_slice %262 {offsets = [0, 64], sizes = [8, 32], strides = [1, 1]} : vector<8x96xf32> to vector<8x32xf32>
    %281 = vector.broadcast %11 : vector<1x32xf32> to vector<8x32xf32>
    %282 = arith.addf %280, %281 : vector<8x32xf32>
    %283 = arith.mulf %270, %282 : vector<8x32xf32>
    %284 = arith.addf %279, %283 : vector<8x32xf32>
    %285 = math.tanh %284 : vector<8x32xf32>
    %cst_68 = arith.constant 1.000000e+00 : f32
    %286 = vector.broadcast %cst_68 : f32 to vector<8x32xf32>
    %287 = arith.subf %286, %278 : vector<8x32xf32>
    %288 = arith.mulf %287, %285 : vector<8x32xf32>
    %289 = arith.mulf %278, %255 : vector<8x32xf32>
    %290 = arith.addf %288, %289 : vector<8x32xf32>
    %291 = arith.index_cast %259 : i32 to index
    %c0_69 = arith.constant 0 : index
    %292 = vector.load %arg7[%291, %c0_69] : memref<64x32xf32, #tpu.memory_space<vmem>>, vector<8x32xf32>
    tpu.vector_store %arg7[%291, %c0_69], %290 {strides = array<i32>} : memref<64x32xf32, #tpu.memory_space<vmem>>, vector<8x32xf32>,
    %c8_i32_70 = arith.constant 8 : i32
    %c0_71 = arith.constant 0 : index
    %c0_72 = arith.constant 0 : index
    %293 = vector.load %arg8[%c0_71, %c0_72] : memref<8x32xf32, #tpu.memory_space<vmem>>, vector<8x32xf32>
    tpu.vector_store %arg8[%c0_71, %c0_72], %290 {strides = array<i32>} : memref<8x32xf32, #tpu.memory_space<vmem>>, vector<8x32xf32>,
    return
  }
  func.func @transform_0(%arg0: i32) -> (i32, i32) {
    %c0_i32 = arith.constant 0 : i32
    %c0_i32_0 = arith.constant 0 : i32
    return %arg0, %c0_i32 : i32, i32
  }
  func.func @transform_1(%arg0: i32) -> (i32, i32) {
    %c0_i32 = arith.constant 0 : i32
    %c0_i32_0 = arith.constant 0 : i32
    %c0_i32_1 = arith.constant 0 : i32
    return %c0_i32, %c0_i32_0 : i32, i32
  }
  func.func @transform_2(%arg0: i32) -> (i32, i32) {
    %c0_i32 = arith.constant 0 : i32
    %c0_i32_0 = arith.constant 0 : i32
    %c0_i32_1 = arith.constant 0 : i32
    return %c0_i32, %c0_i32_0 : i32, i32
  }
  func.func @transform_3(%arg0: i32) -> (i32, i32) {
    %c0_i32 = arith.constant 0 : i32
    %c0_i32_0 = arith.constant 0 : i32
    %c0_i32_1 = arith.constant 0 : i32
    return %c0_i32, %c0_i32_0 : i32, i32
  }
  func.func @transform_4(%arg0: i32) -> (i32, i32) {
    %c0_i32 = arith.constant 0 : i32
    %c0_i32_0 = arith.constant 0 : i32
    %c0_i32_1 = arith.constant 0 : i32
    return %c0_i32, %c0_i32_0 : i32, i32
  }
  func.func @transform_5(%arg0: i32) -> (i32, i32) {
    %c0_i32 = arith.constant 0 : i32
    %c0_i32_0 = arith.constant 0 : i32
    %c0_i32_1 = arith.constant 0 : i32
    return %c0_i32, %c0_i32_0 : i32, i32
  }
  func.func @transform_6(%arg0: i32) -> (i32, i32) {
    %c0_i32 = arith.constant 0 : i32
    %c0_i32_0 = arith.constant 0 : i32
    return %arg0, %c0_i32 : i32, i32
  }
}

module attributes {stable_mosaic.version = 11 : i64} {
  func.func @matmul_bias_kernel(%arg0: i32, %arg1: i32, %arg2: memref<64x32xf32, #tpu.memory_space<vmem>>, %arg3: memref<32x128xf32, #tpu.memory_space<vmem>>, %arg4: memref<1x128xf32, #tpu.memory_space<vmem>>, %arg5: memref<64x128xf32, #tpu.memory_space<vmem>>) attributes {dimension_semantics = [#tpu.dimension_semantics<parallel>, #tpu.dimension_semantics<parallel>], iteration_bounds = array<i64: 1, 1>, scalar_prefetch = 0 : i64, scratch_operands = 0 : i64, tpu.core_type = #tpu.core_type<tc>, window_params = [{transform_indices = @transform_0, window_bounds = array<i64: 64, 32>}, {transform_indices = @transform_1, window_bounds = array<i64: 32, 128>}, {transform_indices = @transform_2, window_bounds = array<i64: 1, 128>}, {transform_indices = @transform_3, window_bounds = array<i64: 64, 128>}]} {
    %c0 = arith.constant 0 : index
    %c0_0 = arith.constant 0 : index
    %0 = vector.load %arg2[%c0, %c0_0] : memref<64x32xf32, #tpu.memory_space<vmem>>, vector<64x32xf32>
    %c0_1 = arith.constant 0 : index
    %c0_2 = arith.constant 0 : index
    %1 = vector.load %arg3[%c0_1, %c0_2] : memref<32x128xf32, #tpu.memory_space<vmem>>, vector<32x128xf32>
    %cst = arith.constant dense<0.000000e+00> : vector<64x128xf32>
    %2 = tpu.matmul %0, %1, %cst {dimension_numbers = #tpu.dot_dimension_numbers<[1], [0], [0], [1], [0, 0, 1, 1], [], []>} : vector<64x32xf32>, vector<32x128xf32>, vector<64x128xf32> -> vector<64x128xf32>
    %c0_3 = arith.constant 0 : index
    %c0_4 = arith.constant 0 : index
    %3 = vector.load %arg4[%c0_3, %c0_4] : memref<1x128xf32, #tpu.memory_space<vmem>>, vector<1x128xf32>
    %4 = vector.broadcast %3 : vector<1x128xf32> to vector<64x128xf32>
    %5 = arith.addf %2, %4 : vector<64x128xf32>
    %c0_5 = arith.constant 0 : index
    %c0_6 = arith.constant 0 : index
    %6 = vector.load %arg5[%c0_5, %c0_6] : memref<64x128xf32, #tpu.memory_space<vmem>>, vector<64x128xf32>
    tpu.vector_store %arg5[%c0_5, %c0_6], %5 {strides = array<i32>} : memref<64x128xf32, #tpu.memory_space<vmem>>, vector<64x128xf32>,
    return
  }
  func.func @transform_0(%arg0: i32, %arg1: i32) -> (i32, i32) {
    %c0_i32 = arith.constant 0 : i32
    %c0_i32_0 = arith.constant 0 : i32
    return %arg0, %c0_i32 : i32, i32
  }
  func.func @transform_1(%arg0: i32, %arg1: i32) -> (i32, i32) {
    %c0_i32 = arith.constant 0 : i32
    %c0_i32_0 = arith.constant 0 : i32
    return %c0_i32, %arg1 : i32, i32
  }
  func.func @transform_2(%arg0: i32, %arg1: i32) -> (i32, i32) {
    %c0_i32 = arith.constant 0 : i32
    %c0_i32_0 = arith.constant 0 : i32
    return %c0_i32, %arg1 : i32, i32
  }
  func.func @transform_3(%arg0: i32, %arg1: i32) -> (i32, i32) {
    %c0_i32 = arith.constant 0 : i32
    return %arg0, %arg1 : i32, i32
  }
}

</mosaic_0001>

<bundles_post_ra>
// kernel: mini_llm_forward.3
= control target key start
LH: loop header
LB: loop body
LE: loop exit
PB: predicated region body
PF: predicated region fallthrough
CT: control target
= control target key end

     0   :  { %vm30_vm0 = vcmask 261120   ;;  %s220_s1 = inlined_call_operand.vmem [shape: f32[32,128], index: 1, kind: input, shape index: {}]   ;;  %s221_s0 = inlined_call_operand.vmem [shape: f32[64,32], index: 0, kind: input, shape index: {}]   ;;  %s222_s2 = inlined_call_operand.vmem [shape: f32[1,128], index: 2, kind: input, shape index: {}]   ;;  %s223_s3 = inlined_call_operand.vmem [shape: f32[64,128], index: 3, kind: output, shape index: {}]  }
   0x1   :  { %v25_v0 = vld [vmem:[%s220_s1 + $0x18] sm:$0xff]  ;;  %v24_v1 = vld [vmem:[%s220_s1 + $0x10] sm:$0xff]  ;;  %v23_v2 = vld [vmem:[%s220_s1 + $0x8] sm:$0xff] }
   0x2   :  { %117 = vmatpush.msra.mxu2 %v25_v0  ;;  %118 = vmatpush.msra.mxu3 %v25_v0  ;;  %v22_v3 = vld [vmem:[%s220_s1] sm:$0xff]  ;;  %v20_v5 = vld [vmem:[%s221_s0 + $0x30] sm:$0xff]  ;;  %v19_v8 = vld [vmem:[%s221_s0 + $0x28] sm:$0xff] }
   0x3   :  { %67 = vmatpush.msra.mxu0 %v25_v0  ;;  %116 = vmatpush.msra.mxu1 %v25_v0  ;;  %v18_v4 = vld [vmem:[%s221_s0 + $0x20] sm:$0xff]  ;;  %v16_v7 = vld [vmem:[%s221_s0 + $0x10] sm:$0xff]  ;;  %v21_v9 = vld [vmem:[%s221_s0 + $0x38] sm:$0xff] }
   0x4   :  { %120 = vmatpush.msra.mxu2 %v24_v1  ;;  %121 = vmatpush.msra.mxu3 %v24_v1  ;;  %v14_v6 = vld [vmem:[%s221_s0] sm:$0xff]  ;;  %v15_v10 = vld [vmem:[%s221_s0 + $0x8] sm:$0xff]  ;;  %v17_v11 = vld [vmem:[%s221_s0 + $0x18] sm:$0xff] }
   0x5   :  { %68 = vmatpush.msra.mxu0 %v24_v1  ;;  %119 = vmatpush.msra.mxu1 %v24_v1  ;;  %v128_v12 = vld [vmem:[%s222_s2] ss:$0 sm:$0xff] }
   0x6   :  { %123 = vmatpush.msra.mxu2 %v23_v2  ;;  %124 = vmatpush.msra.mxu3 %v23_v2 }
   0x7   :  { %69 = vmatpush.msra.mxu0 %v23_v2  ;;  %122 = vmatpush.msra.mxu1 %v23_v2 }
   0x8   :  { %126 = vmatpush.msra.mxu2 %v22_v3  ;;  %127 = vmatpush.msra.mxu3 %v22_v3 }
   0x9   :  { %112 = vmatmul.msk.f32.vlgmr.msra.gmra.mxu2 %vm30_vm0, %v18_v4  ;;  %114 = vmatmul.msk.f32.vlgmr.msra.gmra.mxu3 %vm30_vm0, %v20_v5 }
   0xa   :  { %70 = vmatpush.msra.mxu0 %v22_v3  ;;  %125 = vmatpush.msra.mxu1 %v22_v3 }
   0xb   :  { %108 = vmatmul.msk.f32.vlgmr.msra.gmra.mxu0 %vm30_vm0, %v14_v6  ;;  %110 = vmatmul.msk.f32.vlgmr.msra.gmra.mxu1 %vm30_vm0, %v16_v7 }
  0x11   :  { %113 = vmatmul.msk.f32.gmra.mxu2 %vm30_vm0, %v19_v8  ;;  %115 = vmatmul.msk.f32.gmra.mxu3 %vm30_vm0, %v21_v9 }
  0x13   :  { %109 = vmatmul.msk.f32.gmra.mxu0 %vm30_vm0, %v15_v10  ;;  %111 = vmatmul.msk.f32.gmra.mxu1 %vm30_vm0, %v17_v11 }
  0x88   :  { %v72_v13 = vpop.f32.mrf.mxu0  ;;  %v78_v14 = vpop.f32.mrf.mxu1 }
  0x89   :  { %v73_v15 = vadd.f32 %v128_v12, %v72_v13  ;;  %v79_v16 = vadd.f32 %v128_v12, %v78_v14 }
  0x8b   :  { %96 = vst [vmem:[%s223_s3] sm:$0xff] %v73_v15 }
  0x8c   :  { %98 = vst [vmem:[%s223_s3 + $0x10] sm:$0xff] %v79_v16  ;;  %v84_v17 = vpop.f32.mrf.mxu2  ;;  %v90_v18 = vpop.f32.mrf.mxu3 }
  0x8d   :  { %v85_v19 = vadd.f32 %v128_v12, %v84_v17  ;;  %v91_v20 = vadd.f32 %v128_v12, %v90_v18 }
  0x8f   :  { %100 = vst [vmem:[%s223_s3 + $0x20] sm:$0xff] %v85_v19 }
  0x90   :  { %102 = vst [vmem:[%s223_s3 + $0x30] sm:$0xff] %v91_v20  ;;  %v75_v21 = vpop.f32.mrf.mxu0  ;;  %v81_v22 = vpop.f32.mrf.mxu1 }
  0x91   :  { %v76_v23 = vadd.f32 %v128_v12, %v75_v21  ;;  %v82_v24 = vadd.f32 %v128_v12, %v81_v22 }
  0x93   :  { %97 = vst [vmem:[%s223_s3 + $0x8] sm:$0xff] %v76_v23 }
  0x94   :  { %99 = vst [vmem:[%s223_s3 + $0x18] sm:$0xff] %v82_v24  ;;  %v87_v25 = vpop.f32.mrf.mxu2  ;;  %v93_v26 = vpop.f32.mrf.mxu3 }
  0x95   :  { %v88_v27 = vadd.f32 %v128_v12, %v87_v25  ;;  %v94_v28 = vadd.f32 %v128_v12, %v93_v26 }
  0x97   :  { %101 = vst [vmem:[%s223_s3 + $0x28] sm:$0xff] %v88_v27 }
  0x98   :  { %103 = vst [vmem:[%s223_s3 + $0x38] sm:$0xff] %v94_v28 }

// kernel: mini_llm_forward.2
= control target key start
LH: loop header
LB: loop body
LE: loop exit
PB: predicated region body
PF: predicated region fallthrough
CT: control target
= control target key end

     0   :  { %vm28_vm0 = vcmask 261120   ;;  %s795_s13 = smov 64   ;;  %s796_s19 = smov 32   ;;  %vm112_vm1 = vcmask 785408   ;;  %s1041_s2 = inlined_call_operand.vmem [shape: f32[32,96], index: 2, kind: input, shape index: {}]   ;;  %s1042_s1 = inlined_call_operand.vmem [shape: f32[8,32], index: 1, kind: input, shape index: {}]   ;;  %s1043_s5 = inlined_call_operand.vmem [shape: f32[1,32], index: 5, kind: input, shape index: {}]   ;;  %s1044_s0 = inlined_call_operand.vmem [shape: f32[64,32], index: 0, kind: input, shape index: {}]   ;;  %s1045_s3 = inlined_call_operand.vmem [shape: f32[32,96], index: 3, kind: input, shape index: {}]   ;;  %s1046_s4 = inlined_call_operand.vmem [shape: f32[1,96], index: 4, kind: input, shape index: {}]   ;;  %s1047_s6 = inlined_call_operand.vmem [shape: f32[64,32], index: 6, kind: output, shape index: {}]  }
   0x1   :  { %v41_v0 = vld [vmem:[%s1041_s2 + $0x18] sm:$0xff]  ;;  %v40_v1 = vld [vmem:[%s1041_s2 + $0x10] sm:$0xff]  ;;  %v39_v2 = vld [vmem:[%s1041_s2 + $0x8] sm:$0xff] }
   0x2   :  { %83 = vmatpush.msra.mxu0 %v41_v0  ;;  %730 = vmatpush.msra.mxu1 %v41_v0  ;;  %v27_v3 = vld [vmem:[%s1042_s1] sm:$0xff]  ;;  %v861_v8 = vld [vmem:[%s1045_s3 + $0x18] sm:$0xff]  ;;  %v869_v9 = vld [vmem:[%s1045_s3 + $0x10] sm:$0xff] }
   0x3   :  { %731 = vmatpush.msra.mxu2 %v41_v0  ;;  %732 = vmatpush.msra.mxu3 %v41_v0  ;;  %v38_v4 = vld [vmem:[%s1041_s2] sm:$0xff]  ;;  %29 = vst.msk [vmem:[#allocation2] sm:$0xff] %vm28_vm0, %v27_v3  ;;  %v875_v10 = vld [vmem:[%s1045_s3 + $0x8] sm:$0xff] }
   0x4   :  { %84 = vmatpush.msra.mxu0 %v40_v1  ;;  %733 = vmatpush.msra.mxu1 %v40_v1  ;;  %v745_v5 = vld [vmem:[%s1043_s5] ss:$0 sm:$0xff]  ;;  %v35_v41 = vld [vmem:[%s1044_s0 + $0x28] sm:$0xff] }
   0x5   :  { %734 = vmatpush.msra.mxu2 %v40_v1  ;;  %735 = vmatpush.msra.mxu3 %v40_v1  ;;  %v30_v6 = vld [vmem:[%s1044_s0] sm:$0xff]  ;;  %v31_v42 = vld [vmem:[%s1044_s0 + $0x8] sm:$0xff] }
   0x6   :  { %85 = vmatpush.msra.mxu0 %v39_v2  ;;  %736 = vmatpush.msra.mxu1 %v39_v2  ;;  %v34_v7 = vld [vmem:[%s1044_s0 + $0x20] sm:$0xff] }
   0x7   :  { %173 = vrot.lane.b32.xlu0 %v745_v5, %s795_s13  ;;  %737 = vmatpush.msra.mxu2 %v39_v2  ;;  %v882_v12 = vld [vmem:[%s1045_s3] sm:$0xff] }
   0x8   :  { %86 = vmatpush.msra.mxu0 %v38_v4  ;;  %739 = vmatpush.msra.mxu1 %v38_v4  ;;  %v905_v13 = vld [vmem:[%s1046_s4] ss:$0 sm:$0xff]  ;;  %s797_s4 = smov 96  }
   0x9   :  { %699 = vmatmul.msk.f32.vlgmr.msra.gmra.mxu0 %vm28_vm0, %v30_v6  ;;  %703 = vmatmul.msk.f32.vlgmr.msra.gmra.mxu1 %vm28_vm0, %v34_v7 }
   0xa   :  { %143 = vmatpush.msrb.mxu1 %v861_v8  ;;  %740 = vmatpush.msra.mxu2 %v38_v4  ;;  %v126_v11 = vld [vmem:[#allocation2] sm:$0xff] }
   0xb   :  { %738 = vmatpush.msra.mxu3 %v39_v2  ;;  %194 = vrot.lane.b32.xlu2 %v126_v11, %s796_s19 }
   0xc   :  { %220 = vmatpush.msrb.mxu2 %v861_v8  ;;  %144 = vmatpush.msrb.mxu1 %v869_v9 }
   0xd   :  { %741 = vmatpush.msra.mxu3 %v38_v4  ;;  %704 = vmatmul.msk.f32.vlgmr.msra.gmra.mxu2 %vm28_vm0, %v35_v41 }
   0xe   :  { %221 = vmatpush.msrb.mxu2 %v869_v9  ;;  %145 = vmatpush.msrb.mxu1 %v875_v10 }
   0xf   :  { %290 = vmatpush.msrb.mxu3 %v861_v8 }
  0x10   :  { %222 = vmatpush.msrb.mxu2 %v875_v10  ;;  %146 = vmatpush.msrb.mxu1 %v882_v12 }
  0x11   :  { %707 = vmatmul.msk.f32.vlgmr.msrb.gmra.mxu1 %vm28_vm0, %v126_v11  ;;  %291 = vmatpush.msrb.mxu3 %v869_v9 }
  0x12   :  { %223 = vmatpush.msrb.mxu2 %v882_v12  ;;  %360 = vmatpush.msra.mxu1 %v861_v8 }
  0x13   :  { %292 = vmatpush.msrb.mxu3 %v875_v10  ;;  %700 = vmatmul.msk.f32.gmra.mxu0 %vm28_vm0, %v31_v42 }
  0x14   :  { %361 = vmatpush.msra.mxu1 %v869_v9  ;;  %430 = vmatpush.msra.mxu2 %v861_v8 }
  0x15   :  { %293 = vmatpush.msrb.mxu3 %v882_v12 }
  0x16   :  { %362 = vmatpush.msra.mxu1 %v875_v10  ;;  %431 = vmatpush.msra.mxu2 %v869_v9 }
  0x18   :  { %363 = vmatpush.msra.mxu1 %v882_v12  ;;  %432 = vmatpush.msra.mxu2 %v875_v10 }
  0x1a   :  { %570 = vmatpush.msrb.mxu1 %v861_v8  ;;  %433 = vmatpush.msra.mxu2 %v882_v12 }
  0x1c   :  { %571 = vmatpush.msrb.mxu1 %v869_v9 }
  0x1e   :  { %572 = vmatpush.msrb.mxu1 %v875_v10 }
  0x20   :  { %573 = vmatpush.msrb.mxu1 %v882_v12 }
  0x65   :  { %v195_v43 = vpop.permute.xlu2 %194 }
  0x79   :  { %v911_v18 = vpop.permute.xlu0 %173 }
  0x86   :  { %v88_v14 = vpop.f32.mrf.mxu0  ;;  %v100_v15 = vpop.f32.mrf.mxu1 }
  0x87   :  { %v89_v16 = vadd.f32 %v905_v13, %v88_v14  ;;  %v101_v17 = vadd.f32 %v905_v13, %v100_v15 }
  0x89   :  { %113 = vst.msk [vmem:[#allocation3] sm:$0xff] %vm112_vm1, %v89_v16 }
  0x8a   :  { %117 = vst.msk [vmem:[#allocation3 + $0x20] sm:$0xff] %vm112_vm1, %v101_v17  ;;  %v36_v17 = vld [vmem:[%s1044_s0 + $0x30] sm:$0xff] }
  0x8b   :  { %705 = vmatmul.msk.f32.vlgmr.msra.gmra.mxu3 %vm28_vm0, %v36_v17 }
  0x8c   :  { %500 = vmatpush.msra.mxu3 %v861_v8 }
  0x8e   :  { %v148_v19 = vpop.f32.mrf.mxu1  ;;  %501 = vmatpush.msra.mxu3 %v869_v9 }
  0x8f   :  { %v176_v20 = vadd.f32 %v911_v18, %v148_v19 }
  0x90   :  { %v127_v21 = vld [vmem:[#allocation3] sm:$0xff]  ;;  %v91_v50 = vpop.f32.mrf.mxu0  ;;  %v103_v52 = vpop.f32.mrf.mxu2  ;;  %502 = vmatpush.msra.mxu3 %v875_v10 }
  0x91   :  { %178 = vrot.lane.b32.xlu0 %v176_v20, %s795_s13  ;;  %v151_v22 = vadd.f32 %v148_v19, %v127_v21  ;;  %v92_v51 = vadd.f32 %v905_v13, %v91_v50  ;;  %v104_v53 = vadd.f32 %v905_v13, %v103_v52  ;;  %v32_v19 = vld [vmem:[%s1044_s0 + $0x10] sm:$0xff]  ;;  %v37_v20 = vld [vmem:[%s1044_s0 + $0x38] sm:$0xff] }
  0x92   :  { %701 = vmatmul.msk.f32.gmra.mxu0 %vm28_vm0, %v32_v19  ;;  %503 = vmatpush.msra.mxu3 %v882_v12 }
  0x93   :  { %v708_v23 = vmul.f32 -1.442695, %v151_v22  ;;  %114 = vst.msk [vmem:[#allocation3 + $0x8] sm:$0xff] %vm112_vm1, %v92_v51  ;;  %706 = vmatmul.msk.f32.gmra.mxu3 %vm28_vm0, %v37_v20  ;;  %v33_v51 = vld [vmem:[%s1044_s0 + $0x18] sm:$0xff] }
  0x94   :  { %118 = vst.msk [vmem:[#allocation3 + $0x28] sm:$0xff] %vm112_vm1, %v104_v53 }
  0x95   :  { %747 = vpow2.f32 %v708_v23 }
  0x9a   :  { %v205_v56 = vld [vmem:[#allocation3 + $0x8] sm:$0xff]  ;;  %702 = vmatmul.msk.f32.gmra.mxu0 %vm28_vm0, %v33_v51 }
  0x9b   :  { %v748_v24 = vpop.eup %747 }
  0x9c   :  { %v155_v25 = vadd.f32 1.0, %v748_v24 }
  0x9e   :  { %749 = vrcp.f32 %v155_v25  ;;  %v167_v31 = vand.u32 2147483648, %v155_v25  ;;  %vm161_vm3 = vweird.f32 %v155_v25  ;;  %v165_v32 = vand.u32 2147483647, %v155_v25 }
  0xa0   :  { %v168_v34 = vor.u32 1.1754944e-38, %v167_v31  ;;  %vm166_vm5 = vcmp.eq.f32.partialorder %v165_v32, 8.507059e+37 }
  0xa4   :  { %v750_v26 = vpop.eup %749 }
  0xa5   :  { %v157_v27 = vmul.f32 %v750_v26, %v155_v25  ;;  %vm162_vm2 = vweird.f32 %v750_v26 }
  0xa6   :  { %vm163_vm4 = vmor %vm161_vm3, %vm162_vm2 }
  0xa7   :  { %v158_v28 = vsub.f32 1.0, %v157_v27 }
  0xa9   :  { %v159_v29 = vmul.f32 %v750_v26, %v158_v28 }
  0xab   :  { %v160_v30 = vadd.f32 %v750_v26, %v159_v29 }
  0xad   :  { %v164_v33 = vsel %vm163_vm4, %v750_v26, %v160_v30 }
  0xae   :  { %v169_v35 = vsel %vm166_vm5, %v168_v34, %v164_v33 }
  0xaf   :  { %v188_v44 = vsub.f32 1.0, %v169_v35  ;;  %v197_v46 = vmul.f32 %v195_v43, %v169_v35 }
 0x103   :  { %v179_v36 = vpop.permute.xlu0 %178 }
 0x104   :  { %v181_v37 = vmul.f32 %v179_v36, %v169_v35 }
 0x106   :  { %183 = vrot.lane.b32.xlu1 %v181_v37, %s795_s13 }
 0x10e   :  { %v106_v26 = vpop.f32.mrf.mxu3 }
 0x10f   :  { %v107_v27 = vadd.f32 %v905_v13, %v106_v26 }
 0x111   :  { %119 = vst.msk [vmem:[#allocation3 + $0x30] sm:$0xff] %vm112_vm1, %v107_v27 }
 0x178   :  { %v184_v38 = vpop.permute.xlu1 %183 }
 0x179   :  { %v186_v39 = vadd.f32 %v184_v38, %v127_v21 }
 0x17b   :  { %751 = vtanh.f32 %v186_v39 }
 0x181   :  { %v752_v40 = vpop.eup %751 }
 0x182   :  { %190 = vrot.lane.b32.xlu1 %v752_v40, %s797_s4 }
 0x1f4   :  { %v191_v45 = vpop.permute.xlu1 %190 }
 0x1f5   :  { %v193_v47 = vmul.f32 %v191_v45, %v188_v44 }
 0x1f7   :  { %v198_v48 = vadd.f32 %v197_v46, %v193_v47 }
 0x1f9   :  { %200 = vrot.lane.b32.xlu2 %v198_v48, %s797_s4 }
 0x253   :  { %v201_v49 = vpop.permute.xlu2 %200 }
 0x254   :  { %203 = vst.msk [vmem:[%s1047_s6] sm:$0xff] %vm28_vm0, %v201_v49  ;;  %709 = vmatmul.msk.f32.vlgmr.msrb.gmra.mxu2 %vm28_vm0, %v201_v49 }
 0x255   :  { %640 = vmatpush.msrb.mxu2 %v861_v8  ;;  %v94_v8 = vpop.f32.mrf.mxu0 }
 0x257   :  { %641 = vmatpush.msrb.mxu2 %v869_v9  ;;  %v95_v9 = vadd.f32 %v905_v13, %v94_v8 }
 0x259   :  { %642 = vmatpush.msrb.mxu2 %v875_v10  ;;  %115 = vst.msk [vmem:[#allocation3 + $0x10] sm:$0xff] %vm112_vm1, %v95_v9  ;;  %v109_v10 = vpop.f32.mrf.mxu3 }
 0x25b   :  { %643 = vmatpush.msrb.mxu2 %v882_v12  ;;  %v110_v12 = vadd.f32 %v905_v13, %v109_v10 }
 0x25d   :  { %120 = vst.msk [vmem:[#allocation3 + $0x38] sm:$0xff] %vm112_vm1, %v110_v12  ;;  %v415_v12 = vld [vmem:[#allocation3 + $0x20] sm:$0xff] }
 0x260   :  { %v275_v31 = vld [vmem:[#allocation3 + $0x10] sm:$0xff] }
 0x2d7   :  { %v225_v54 = vpop.f32.mrf.mxu2 }
 0x2d8   :  { %v248_v55 = vadd.f32 %v225_v54, %v911_v18  ;;  %v228_v57 = vadd.f32 %v225_v54, %v205_v56 }
 0x2da   :  { %250 = vrot.lane.b32.xlu0 %v248_v55, %s795_s13  ;;  %v710_v58 = vmul.f32 -1.442695, %v228_v57  ;;  %v97_v57 = vpop.f32.mrf.mxu0 }
 0x2dc   :  { %753 = vpow2.f32 %v710_v58  ;;  %v98_v58 = vadd.f32 %v905_v13, %v97_v57 }
 0x2de   :  { %116 = vst.msk [vmem:[#allocation3 + $0x18] sm:$0xff] %vm112_vm1, %v98_v58 }
 0x2e2   :  { %v754_v59 = vpop.eup %753 }
 0x2e3   :  { %v232_v60 = vadd.f32 1.0, %v754_v59 }
 0x2e5   :  { %755 = vrcp.f32 %v232_v60  ;;  %v244_v2 = vand.u32 2147483648, %v232_v60  ;;  %vm238_vm7 = vweird.f32 %v232_v60  ;;  %v242_v3 = vand.u32 2147483647, %v232_v60 }
 0x2e7   :  { %v245_v5 = vor.u32 1.1754944e-38, %v244_v2  ;;  %vm243_vm9 = vcmp.eq.f32.partialorder %v242_v3, 8.507059e+37 }
 0x2eb   :  { %v756_v61 = vpop.eup %755 }
 0x2ec   :  { %v234_v62 = vmul.f32 %v756_v61, %v232_v60  ;;  %vm239_vm6 = vweird.f32 %v756_v61 }
 0x2ed   :  { %vm240_vm8 = vmor %vm238_vm7, %vm239_vm6 }
 0x2ee   :  { %v235_v63 = vsub.f32 1.0, %v234_v62  ;;  %v345_v62 = vld [vmem:[#allocation3 + $0x18] sm:$0xff] }
 0x2f0   :  { %v236_v0 = vmul.f32 %v756_v61, %v235_v63 }
 0x2f2   :  { %v237_v1 = vadd.f32 %v756_v61, %v236_v0 }
 0x2f4   :  { %v241_v4 = vsel %vm240_vm8, %v756_v61, %v237_v1 }
 0x2f5   :  { %v246_v7 = vsel %vm243_vm9, %v245_v5, %v241_v4 }
 0x2f6   :  { %v260_v21 = vsub.f32 1.0, %v246_v7  ;;  %v266_v23 = vmul.f32 %v246_v7, %v198_v48 }
 0x34c   :  { %v251_v6 = vpop.permute.xlu0 %250 }
 0x34d   :  { %v253_v11 = vmul.f32 %v251_v6, %v246_v7 }
 0x34f   :  { %255 = vrot.lane.b32.xlu1 %v253_v11, %s795_s13 }
 0x3c1   :  { %v256_v14 = vpop.permute.xlu1 %255 }
 0x3c2   :  { %v258_v15 = vadd.f32 %v256_v14, %v205_v56 }
 0x3c4   :  { %757 = vtanh.f32 %v258_v15 }
 0x3ca   :  { %v758_v16 = vpop.eup %757 }
 0x3cb   :  { %262 = vrot.lane.b32.xlu2 %v758_v16, %s797_s4 }
 0x425   :  { %v263_v22 = vpop.permute.xlu2 %262 }
 0x426   :  { %v265_v24 = vmul.f32 %v263_v22, %v260_v21 }
 0x428   :  { %v267_v25 = vadd.f32 %v266_v23, %v265_v24 }
 0x42a   :  { %269 = vrot.lane.b32.xlu0 %v267_v25, %s797_s4 }
 0x49c   :  { %v270_v28 = vpop.permute.xlu0 %269 }
 0x49d   :  { %711 = vst.msk [vmem:[%s1047_s6 + $0x8] sm:$0xff] %vm28_vm0, %v270_v28  ;;  %712 = vmatmul.msk.f32.vlgmr.msrb.gmra.mxu3 %vm28_vm0, %v270_v28 }
 0x520   :  { %v295_v29 = vpop.f32.mrf.mxu3 }
 0x521   :  { %v318_v30 = vadd.f32 %v295_v29, %v911_v18  ;;  %v298_v32 = vadd.f32 %v295_v29, %v275_v31 }
 0x523   :  { %320 = vrot.lane.b32.xlu1 %v318_v30, %s795_s13  ;;  %v713_v33 = vmul.f32 -1.442695, %v298_v32 }
 0x525   :  { %759 = vpow2.f32 %v713_v33 }
 0x52b   :  { %v760_v34 = vpop.eup %759 }
 0x52c   :  { %v302_v35 = vadd.f32 1.0, %v760_v34 }
 0x52e   :  { %761 = vrcp.f32 %v302_v35  ;;  %v314_v41 = vand.u32 2147483648, %v302_v35  ;;  %vm308_vm11 = vweird.f32 %v302_v35  ;;  %v312_v42 = vand.u32 2147483647, %v302_v35 }
 0x530   :  { %v315_v44 = vor.u32 1.1754944e-38, %v314_v41  ;;  %vm313_vm13 = vcmp.eq.f32.partialorder %v312_v42, 8.507059e+37 }
 0x534   :  { %v762_v36 = vpop.eup %761 }
 0x535   :  { %v304_v37 = vmul.f32 %v762_v36, %v302_v35  ;;  %vm309_vm10 = vweird.f32 %v762_v36 }
 0x536   :  { %vm310_vm12 = vmor %vm308_vm11, %vm309_vm10 }
 0x537   :  { %v305_v38 = vsub.f32 1.0, %v304_v37 }
 0x539   :  { %v306_v39 = vmul.f32 %v762_v36, %v305_v38 }
 0x53b   :  { %v307_v40 = vadd.f32 %v762_v36, %v306_v39 }
 0x53d   :  { %v311_v43 = vsel %vm310_vm12, %v762_v36, %v307_v40 }
 0x53e   :  { %v316_v46 = vsel %vm313_vm13, %v315_v44, %v311_v43 }
 0x53f   :  { %v330_v52 = vsub.f32 1.0, %v316_v46  ;;  %v336_v54 = vmul.f32 %v316_v46, %v267_v25 }
 0x595   :  { %v321_v45 = vpop.permute.xlu1 %320 }
 0x596   :  { %v323_v47 = vmul.f32 %v321_v45, %v316_v46 }
 0x598   :  { %325 = vrot.lane.b32.xlu2 %v323_v47, %s795_s13 }
 0x5f2   :  { %v326_v48 = vpop.permute.xlu2 %325 }
 0x5f3   :  { %v328_v49 = vadd.f32 %v326_v48, %v275_v31 }
 0x5f5   :  { %763 = vtanh.f32 %v328_v49 }
 0x5fb   :  { %v764_v50 = vpop.eup %763 }
 0x5fc   :  { %332 = vrot.lane.b32.xlu0 %v764_v50, %s797_s4 }
 0x66e   :  { %v333_v53 = vpop.permute.xlu0 %332 }
 0x66f   :  { %v335_v55 = vmul.f32 %v333_v53, %v330_v52 }
 0x671   :  { %v337_v56 = vadd.f32 %v336_v54, %v335_v55  ;;  %v485_v55 = vld [vmem:[#allocation3 + $0x28] sm:$0xff] }
 0x673   :  { %339 = vrot.lane.b32.xlu1 %v337_v56, %s797_s4 }
 0x6e5   :  { %v340_v59 = vpop.permute.xlu1 %339 }
 0x6e6   :  { %714 = vst.msk [vmem:[%s1047_s6 + $0x10] sm:$0xff] %vm28_vm0, %v340_v59  ;;  %715 = vmatmul.msk.f32.vlgmr.msra.gmra.mxu1 %vm28_vm0, %v340_v59 }
 0x763   :  { %v365_v60 = vpop.f32.mrf.mxu1 }
 0x764   :  { %v388_v61 = vadd.f32 %v365_v60, %v911_v18  ;;  %v368_v63 = vadd.f32 %v365_v60, %v345_v62 }
 0x766   :  { %390 = vrot.lane.b32.xlu2 %v388_v61, %s795_s13  ;;  %v716_v0 = vmul.f32 -1.442695, %v368_v63 }
 0x768   :  { %765 = vpow2.f32 %v716_v0 }
 0x76e   :  { %v766_v13 = vpop.eup %765 }
 0x76f   :  { %v372_v1 = vadd.f32 1.0, %v766_v13 }
 0x771   :  { %767 = vrcp.f32 %v372_v1  ;;  %v384_v7 = vand.u32 2147483648, %v372_v1  ;;  %vm378_vm15 = vweird.f32 %v372_v1  ;;  %v382_v11 = vand.u32 2147483647, %v372_v1 }
 0x773   :  { %v385_v15 = vor.u32 1.1754944e-38, %v384_v7  ;;  %vm383_vm2 = vcmp.eq.f32.partialorder %v382_v11, 8.507059e+37 }
 0x777   :  { %v768_v2 = vpop.eup %767 }
 0x778   :  { %v374_v3 = vmul.f32 %v768_v2, %v372_v1  ;;  %vm379_vm14 = vweird.f32 %v768_v2 }
 0x779   :  { %vm380_vm1 = vmor %vm378_vm15, %vm379_vm14 }
 0x77a   :  { %v375_v4 = vsub.f32 1.0, %v374_v3 }
 0x77c   :  { %v376_v5 = vmul.f32 %v768_v2, %v375_v4 }
 0x77e   :  { %v377_v6 = vadd.f32 %v768_v2, %v376_v5 }
 0x780   :  { %v381_v14 = vsel %vm380_vm1, %v768_v2, %v377_v6 }
 0x781   :  { %v386_v17 = vsel %vm383_vm2, %v385_v15, %v381_v14 }
 0x782   :  { %v400_v23 = vsub.f32 1.0, %v386_v17  ;;  %v406_v25 = vmul.f32 %v386_v17, %v337_v56 }
 0x7c0   :  { %v391_v16 = vpop.permute.xlu2 %390 }
 0x7c1   :  { %v393_v19 = vmul.f32 %v391_v16, %v386_v17 }
 0x7c3   :  { %395 = vrot.lane.b32.xlu0 %v393_v19, %s795_s13 }
 0x835   :  { %v396_v20 = vpop.permute.xlu0 %395 }
 0x836   :  { %v398_v21 = vadd.f32 %v396_v20, %v345_v62 }
 0x838   :  { %769 = vtanh.f32 %v398_v21 }
 0x83e   :  { %v770_v22 = vpop.eup %769 }
 0x83f   :  { %402 = vrot.lane.b32.xlu1 %v770_v22, %s797_s4 }
 0x8b1   :  { %v403_v24 = vpop.permute.xlu1 %402 }
 0x8b2   :  { %v405_v8 = vmul.f32 %v403_v24, %v400_v23  ;;  %v555_v24 = vld [vmem:[#allocation3 + $0x30] sm:$0xff] }
 0x8b4   :  { %v407_v9 = vadd.f32 %v406_v25, %v405_v8 }
 0x8b6   :  { %409 = vrot.lane.b32.xlu2 %v407_v9, %s797_s4 }
 0x910   :  { %v410_v26 = vpop.permute.xlu2 %409 }
 0x911   :  { %717 = vst.msk [vmem:[%s1047_s6 + $0x18] sm:$0xff] %vm28_vm0, %v410_v26  ;;  %718 = vmatmul.msk.f32.vlgmr.msra.gmra.mxu2 %vm28_vm0, %v410_v26 }
 0x994   :  { %v435_v27 = vpop.f32.mrf.mxu2 }
 0x995   :  { %v458_v10 = vadd.f32 %v435_v27, %v911_v18  ;;  %v438_v28 = vadd.f32 %v435_v27, %v415_v12 }
 0x997   :  { %460 = vrot.lane.b32.xlu0 %v458_v10, %s795_s13  ;;  %v719_v29 = vmul.f32 -1.442695, %v438_v28 }
 0x999   :  { %771 = vpow2.f32 %v719_v29 }
 0x99f   :  { %v772_v30 = vpop.eup %771 }
 0x9a0   :  { %v442_v31 = vadd.f32 1.0, %v772_v30 }
 0x9a2   :  { %773 = vrcp.f32 %v442_v31  ;;  %v454_v37 = vand.u32 2147483648, %v442_v31  ;;  %vm448_vm4 = vweird.f32 %v442_v31  ;;  %v452_v38 = vand.u32 2147483647, %v442_v31 }
 0x9a4   :  { %v455_v40 = vor.u32 1.1754944e-38, %v454_v37  ;;  %vm453_vm6 = vcmp.eq.f32.partialorder %v452_v38, 8.507059e+37 }
 0x9a8   :  { %v774_v32 = vpop.eup %773 }
 0x9a9   :  { %v444_v33 = vmul.f32 %v774_v32, %v442_v31  ;;  %vm449_vm3 = vweird.f32 %v774_v32 }
 0x9aa   :  { %vm450_vm5 = vmor %vm448_vm4, %vm449_vm3 }
 0x9ab   :  { %v445_v34 = vsub.f32 1.0, %v444_v33 }
 0x9ad   :  { %v446_v35 = vmul.f32 %v774_v32, %v445_v34 }
 0x9af   :  { %v447_v36 = vadd.f32 %v774_v32, %v446_v35 }
 0x9b1   :  { %v451_v39 = vsel %vm450_vm5, %v774_v32, %v447_v36 }
 0x9b2   :  { %v456_v42 = vsel %vm453_vm6, %v455_v40, %v451_v39 }
 0x9b3   :  { %v470_v47 = vsub.f32 1.0, %v456_v42  ;;  %v476_v49 = vmul.f32 %v456_v42, %v407_v9 }
 0xa09   :  { %v461_v41 = vpop.permute.xlu0 %460 }
 0xa0a   :  { %v463_v43 = vmul.f32 %v461_v41, %v456_v42 }
 0xa0c   :  { %465 = vrot.lane.b32.xlu1 %v463_v43, %s795_s13 }
 0xa7e   :  { %v466_v44 = vpop.permute.xlu1 %465 }
 0xa7f   :  { %v468_v45 = vadd.f32 %v466_v44, %v415_v12 }
 0xa81   :  { %775 = vtanh.f32 %v468_v45 }
 0xa87   :  { %v776_v46 = vpop.eup %775 }
 0xa88   :  { %472 = vrot.lane.b32.xlu2 %v776_v46, %s797_s4 }
 0xae2   :  { %v473_v48 = vpop.permute.xlu2 %472 }
 0xae3   :  { %v475_v50 = vmul.f32 %v473_v48, %v470_v47  ;;  %v625_v48 = vld [vmem:[#allocation3 + $0x38] sm:$0xff] }
 0xae5   :  { %v477_v51 = vadd.f32 %v476_v49, %v475_v50 }
 0xae7   :  { %479 = vrot.lane.b32.xlu0 %v477_v51, %s797_s4 }
 0xb59   :  { %v480_v52 = vpop.permute.xlu0 %479 }
 0xb5a   :  { %720 = vst.msk [vmem:[%s1047_s6 + $0x20] sm:$0xff] %vm28_vm0, %v480_v52  ;;  %721 = vmatmul.msk.f32.vlgmr.msra.gmra.mxu3 %vm28_vm0, %v480_v52 }
 0xbdd   :  { %v505_v53 = vpop.f32.mrf.mxu3 }
 0xbde   :  { %v528_v54 = vadd.f32 %v505_v53, %v911_v18  ;;  %v508_v56 = vadd.f32 %v505_v53, %v485_v55 }
 0xbe0   :  { %530 = vrot.lane.b32.xlu1 %v528_v54, %s795_s13  ;;  %v722_v57 = vmul.f32 -1.442695, %v508_v56 }
 0xbe2   :  { %777 = vpow2.f32 %v722_v57 }
 0xbe8   :  { %v778_v58 = vpop.eup %777 }
 0xbe9   :  { %v512_v59 = vadd.f32 1.0, %v778_v58 }
 0xbeb   :  { %779 = vrcp.f32 %v512_v59  ;;  %v524_v13 = vand.u32 2147483648, %v512_v59  ;;  %vm518_vm8 = vweird.f32 %v512_v59  ;;  %v522_v1 = vand.u32 2147483647, %v512_v59 }
 0xbed   :  { %v525_v3 = vor.u32 1.1754944e-38, %v524_v13  ;;  %vm523_vm10 = vcmp.eq.f32.partialorder %v522_v1, 8.507059e+37 }
 0xbf1   :  { %v780_v60 = vpop.eup %779 }
 0xbf2   :  { %v514_v61 = vmul.f32 %v780_v60, %v512_v59  ;;  %vm519_vm7 = vweird.f32 %v780_v60 }
 0xbf3   :  { %vm520_vm9 = vmor %vm518_vm8, %vm519_vm7 }
 0xbf4   :  { %v515_v62 = vsub.f32 1.0, %v514_v61 }
 0xbf6   :  { %v516_v63 = vmul.f32 %v780_v60, %v515_v62 }
 0xbf8   :  { %v517_v0 = vadd.f32 %v780_v60, %v516_v63 }
 0xbfa   :  { %v521_v2 = vsel %vm520_vm9, %v780_v60, %v517_v0 }
 0xbfb   :  { %v526_v5 = vsel %vm523_vm10, %v525_v3, %v521_v2 }
 0xbfc   :  { %v540_v15 = vsub.f32 1.0, %v526_v5  ;;  %v546_v17 = vmul.f32 %v526_v5, %v477_v51 }
 0xc52   :  { %v531_v4 = vpop.permute.xlu1 %530 }
 0xc53   :  { %v533_v6 = vmul.f32 %v531_v4, %v526_v5 }
 0xc55   :  { %535 = vrot.lane.b32.xlu2 %v533_v6, %s795_s13 }
 0xcaf   :  { %v536_v7 = vpop.permute.xlu2 %535 }
 0xcb0   :  { %v538_v11 = vadd.f32 %v536_v7, %v485_v55 }
 0xcb2   :  { %781 = vtanh.f32 %v538_v11 }
 0xcb8   :  { %v782_v14 = vpop.eup %781 }
 0xcb9   :  { %542 = vrot.lane.b32.xlu0 %v782_v14, %s797_s4 }
 0xd2b   :  { %v543_v16 = vpop.permute.xlu0 %542 }
 0xd2c   :  { %v545_v19 = vmul.f32 %v543_v16, %v540_v15 }
 0xd2e   :  { %v547_v20 = vadd.f32 %v546_v17, %v545_v19 }
 0xd30   :  { %549 = vrot.lane.b32.xlu1 %v547_v20, %s797_s4 }
 0xda2   :  { %v550_v21 = vpop.permute.xlu1 %549 }
 0xda3   :  { %723 = vst.msk [vmem:[%s1047_s6 + $0x28] sm:$0xff] %vm28_vm0, %v550_v21  ;;  %724 = vmatmul.msk.f32.vlgmr.msrb.gmra.mxu1 %vm28_vm0, %v550_v21 }
 0xe20   :  { %v575_v22 = vpop.f32.mrf.mxu1 }
 0xe21   :  { %v598_v23 = vadd.f32 %v575_v22, %v911_v18  ;;  %v578_v25 = vadd.f32 %v575_v22, %v555_v24 }
 0xe23   :  { %600 = vrot.lane.b32.xlu2 %v598_v23, %s795_s13  ;;  %v725_v8 = vmul.f32 -1.442695, %v578_v25 }
 0xe25   :  { %783 = vpow2.f32 %v725_v8 }
 0xe2b   :  { %v784_v9 = vpop.eup %783 }
 0xe2c   :  { %v582_v26 = vadd.f32 1.0, %v784_v9 }
 0xe2e   :  { %785 = vrcp.f32 %v582_v26  ;;  %v594_v30 = vand.u32 2147483648, %v582_v26  ;;  %vm588_vm12 = vweird.f32 %v582_v26  ;;  %v592_v31 = vand.u32 2147483647, %v582_v26 }
 0xe30   :  { %v595_v33 = vor.u32 1.1754944e-38, %v594_v30  ;;  %vm593_vm14 = vcmp.eq.f32.partialorder %v592_v31, 8.507059e+37 }
 0xe34   :  { %v786_v27 = vpop.eup %785 }
 0xe35   :  { %v584_v10 = vmul.f32 %v786_v27, %v582_v26  ;;  %vm589_vm11 = vweird.f32 %v786_v27 }
 0xe36   :  { %vm590_vm13 = vmor %vm588_vm12, %vm589_vm11 }
 0xe37   :  { %v585_v12 = vsub.f32 1.0, %v584_v10 }
 0xe39   :  { %v586_v28 = vmul.f32 %v786_v27, %v585_v12 }
 0xe3b   :  { %v587_v29 = vadd.f32 %v786_v27, %v586_v28 }
 0xe3d   :  { %v591_v32 = vsel %vm590_vm13, %v786_v27, %v587_v29 }
 0xe3e   :  { %v596_v35 = vsel %vm593_vm14, %v595_v33, %v591_v32 }
 0xe3f   :  { %v610_v40 = vsub.f32 1.0, %v596_v35  ;;  %v616_v42 = vmul.f32 %v596_v35, %v547_v20 }
 0xe7d   :  { %v601_v34 = vpop.permute.xlu2 %600 }
 0xe7e   :  { %v603_v36 = vmul.f32 %v601_v34, %v596_v35 }
 0xe80   :  { %605 = vrot.lane.b32.xlu0 %v603_v36, %s795_s13 }
 0xef2   :  { %v606_v37 = vpop.permute.xlu0 %605 }
 0xef3   :  { %v608_v38 = vadd.f32 %v606_v37, %v555_v24 }
 0xef5   :  { %787 = vtanh.f32 %v608_v38 }
 0xefb   :  { %v788_v39 = vpop.eup %787 }
 0xefc   :  { %612 = vrot.lane.b32.xlu1 %v788_v39, %s797_s4 }
 0xf6e   :  { %v613_v41 = vpop.permute.xlu1 %612 }
 0xf6f   :  { %v615_v43 = vmul.f32 %v613_v41, %v610_v40 }
 0xf71   :  { %v617_v44 = vadd.f32 %v616_v42, %v615_v43 }
 0xf73   :  { %619 = vrot.lane.b32.xlu2 %v617_v44, %s797_s4 }
 0xfcd   :  { %v620_v45 = vpop.permute.xlu2 %619 }
 0xfce   :  { %726 = vst.msk [vmem:[%s1047_s6 + $0x30] sm:$0xff] %vm28_vm0, %v620_v45  ;;  %727 = vmatmul.msk.f32.vlgmr.msrb.gmra.mxu2 %vm28_vm0, %v620_v45 }
0x1051   :  { %v645_v46 = vpop.f32.mrf.mxu2 }
0x1052   :  { %v668_v47 = vadd.f32 %v645_v46, %v911_v18  ;;  %v648_v49 = vadd.f32 %v645_v46, %v625_v48 }
0x1054   :  { %670 = vrot.lane.b32.xlu0 %v668_v47, %s795_s13  ;;  %v728_v50 = vmul.f32 -1.442695, %v648_v49 }
0x1056   :  { %789 = vpow2.f32 %v728_v50 }
0x105c   :  { %v790_v51 = vpop.eup %789 }
0x105d   :  { %v652_v52 = vadd.f32 1.0, %v790_v51 }
0x105f   :  { %791 = vrcp.f32 %v652_v52  ;;  %v664_v58 = vand.u32 2147483648, %v652_v52  ;;  %vm658_vm1 = vweird.f32 %v652_v52  ;;  %v662_v59 = vand.u32 2147483647, %v652_v52 }
0x1061   :  { %v665_v60 = vor.u32 1.1754944e-38, %v664_v58  ;;  %vm663_vm3 = vcmp.eq.f32.partialorder %v662_v59, 8.507059e+37 }
0x1065   :  { %v792_v53 = vpop.eup %791 }
0x1066   :  { %v654_v54 = vmul.f32 %v792_v53, %v652_v52  ;;  %vm659_vm15 = vweird.f32 %v792_v53 }
0x1067   :  { %vm660_vm2 = vmor %vm658_vm1, %vm659_vm15 }
0x1068   :  { %v655_v55 = vsub.f32 1.0, %v654_v54 }
0x106a   :  { %v656_v56 = vmul.f32 %v792_v53, %v655_v55 }
0x106c   :  { %v657_v57 = vadd.f32 %v792_v53, %v656_v56 }
0x106e   :  { %v661_v18 = vsel %vm660_vm2, %v792_v53, %v657_v57 }
0x106f   :  { %v666_v62 = vsel %vm663_vm3, %v665_v60, %v661_v18 }
0x1070   :  { %v680_v2 = vsub.f32 1.0, %v666_v62  ;;  %v686_v4 = vmul.f32 %v666_v62, %v617_v44 }
0x10c6   :  { %v671_v61 = vpop.permute.xlu0 %670 }
0x10c7   :  { %v673_v63 = vmul.f32 %v671_v61, %v666_v62 }
0x10c9   :  { %675 = vrot.lane.b32.xlu1 %v673_v63, %s795_s13 }
0x113b   :  { %v676_v0 = vpop.permute.xlu1 %675 }
0x113c   :  { %v678_v13 = vadd.f32 %v676_v0, %v625_v48 }
0x113e   :  { %793 = vtanh.f32 %v678_v13 }
0x1144   :  { %v794_v1 = vpop.eup %793 }
0x1145   :  { %682 = vrot.lane.b32.xlu2 %v794_v1, %s797_s4 }
0x119f   :  { %v683_v3 = vpop.permute.xlu2 %682 }
0x11a0   :  { %v685_v5 = vmul.f32 %v683_v3, %v680_v2 }
0x11a2   :  { %v687_v6 = vadd.f32 %v686_v4, %v685_v5 }
0x11a4   :  { %689 = vrot.lane.b32.xlu0 %v687_v6, %s797_s4 }
0x1216   :  { %v690_v7 = vpop.permute.xlu0 %689 }
0x1217   :  { %729 = vst.msk [vmem:[%s1047_s6 + $0x38] sm:$0xff] %vm28_vm0, %v690_v7 }
0x1218   :  { %694 = vst.msk [vmem:[#allocation2] sm:$0xff] %vm28_vm0, %v690_v7 }

</bundles_post_ra>
